<compile_context>
chip_gen: v6e
topology: v6e:2x2x1
jax: 0.10.0
libtpu: 0.0.40
codegen_flags: <defaults>
</compile_context>

<pallas_src>
import jax
import jax.numpy as jnp
from jax import lax
from jax.experimental import pallas as pl
from jax.experimental.pallas import tpu as pltpu

# ----------------------------- sizes ---------------------------------------
B = 2          # batch_size
N = 16         # params.memory_n   (memory rows)
M = 32         # params.memory_m   (memory word size == latent size)
C = 64         # params.controller_size
W = 8          # params.sequence_width
H = 32         # params.variational_hidden_size
AP = M + 1 + 1 + 3 + 1   # addressing params: [k, beta, g, s, gamma]
EPS = 1e-8


# ---------------------------------------------------------------------------
# Fused kernel: LSTM controller step + fc1 + NTM addressing + memory read
#               + variational model (encode / decode / ELBO) + memory write.
# ---------------------------------------------------------------------------
def modelcell_kernel(x_ref, latent_ref, h_ref, c_ref, wprev_ref, mem_ref,
                     w_lstm_ref, b_lstm_ref, w_fc_ref, b_fc_ref,
                     w_enc_ref, b_enc_ref, wmu_ref, bmu_ref,
                     wlv_ref, blv_ref, wd_ref, bd_ref, wo_ref, bo_ref,
                     hc_out_ref, w_out_ref, z_out_ref, xmean_out_ref,
                     mem_out_ref, elbo_out_ref):
    x_in = latent_ref[...]                    # (B, M) controller input (latent)
    h = h_ref[...]                            # (B, C)
    c = c_ref[...]                            # (B, C)
    mem = mem_ref[...]                        # (N, M)
    X = x_ref[...]                            # (B, W)

    # --- LSTM cell (single layer), PyTorch gate order i, f, g, o ------------
    # Single MXU push: [x; h] @ [W_ih; W_hh] + b
    xh = jnp.concatenate([x_in, h], axis=1)   # (B, M+C)
    gates = (jnp.dot(xh, w_lstm_ref[...], preferred_element_type=jnp.float32) +
             b_lstm_ref[...])                 # (B, 4C)
    i_g = jax.nn.sigmoid(gates[:, 0 * C:1 * C])
    f_g = jax.nn.sigmoid(gates[:, 1 * C:2 * C])
    g_g = jnp.tanh(gates[:, 2 * C:3 * C])
    o_g = jax.nn.sigmoid(gates[:, 3 * C:4 * C])
    c_new = f_g * c + i_g * g_g
    h_new = o_g * jnp.tanh(c_new)             # cout

    # --- fc1: addressing parameters, then _split_cols -----------------------
    ap = (jnp.dot(h_new, w_fc_ref[...], preferred_element_type=jnp.float32) +
          b_fc_ref[...])                      # (B, M+6)
    k     = jnp.tanh(ap[:, 0:M])              # (B, M)
    beta  = jax.nn.softplus(ap[:, M:M + 1])   # (B, 1)
    g     = jax.nn.sigmoid(ap[:, M + 1:M + 2])
    s     = jax.nn.softmax(ap[:, M + 2:M + 5], axis=1)   # (B, 3)
    gamma = 1.0 + jax.nn.softplus(ap[:, M + 5:M + 6])    # (B, 1)

    # --- content addressing: cosine similarity + sharpened softmax ----------
    k_n = k / (jnp.sqrt(jnp.sum(k * k, axis=1, keepdims=True)) + EPS)        # (B,M)
    m_n = mem / (jnp.sqrt(jnp.sum(mem * mem, axis=1, keepdims=True)) + EPS)  # (N,M)
    sim = lax.dot_general(k_n, m_n, (((1,), (1,)), ((), ())),
                          preferred_element_type=jnp.float32)                # (B,N)
    wc = jax.nn.softmax(beta * sim, axis=1)

    # --- interpolation gate --------------------------------------------------
    wg = g * wc + (1.0 - g) * wprev_ref[...]                                 # (B,N)

    # --- circular shift convolution with 3-tap kernel s ----------------------
    # result[i] = s0*w[i-1] + s1*w[i] + s2*w[i+1]; shift=N-1 is the circular -1.
    w_shift = (s[:, 0:1] * pltpu.roll(wg, shift=1, axis=1) +
               s[:, 1:2] * wg +
               s[:, 2:3] * pltpu.roll(wg, shift=N - 1, axis=1))

    # --- sharpening -----------------------------------------------------------
    w_pow = jnp.exp(gamma * jnp.log(w_shift + EPS))
    w_new = w_pow / (jnp.sum(w_pow, axis=1, keepdims=True) + EPS)            # (B,N)

    # --- memory read ----------------------------------------------------------
    r = jnp.dot(w_new, mem, preferred_element_type=jnp.float32)              # (B,M)

    # --- variational model: encoder (r, X) -> (mu, logvar) --------------------
    rx = jnp.concatenate([r, X], axis=1)                                     # (B, M+W)
    h_enc = jnp.tanh(jnp.dot(rx, w_enc_ref[...],
                             preferred_element_type=jnp.float32) +
                     b_enc_ref[...])                                          # (B, H)
    mu = (jnp.dot(h_enc, wmu_ref[...], preferred_element_type=jnp.float32) +
          bmu_ref[...])                                                       # (B, M)
    logvar = (jnp.dot(h_enc, wlv_ref[...], preferred_element_type=jnp.float32) +
              blv_ref[...])                                                   # (B, M)

    # TODO(synk): reparameterized sampling z = mu + eps*std omitted (deterministic z = mu).
    z = mu                                                                    # (B, M)

    # --- decoder -> x_mean ----------------------------------------------------
    h_dec = jnp.tanh(jnp.dot(z, wd_ref[...],
                             preferred_element_type=jnp.float32) + bd_ref[...])
    x_mean = (jnp.dot(h_dec, wo_ref[...], preferred_element_type=jnp.float32) +
              bo_ref[...])                                                    # (B, W)

    # --- ELBO = E[log p(X|z)] - KL(q || N(0,I)) -------------------------------
    recon = -0.5 * jnp.sum((X - x_mean) ** 2, axis=1, keepdims=True)          # (B,1)
    kl = 0.5 * jnp.sum(jnp.exp(logvar) + mu * mu - 1.0 - logvar,
                       axis=1, keepdims=True)                                 # (B,1)
    elbo = jnp.sum(recon - kl, axis=0, keepdims=True) / B                     # (1,1)

    # --- memory write: mem <- mem + mean_b w_b^T z_b --------------------------
    outer = lax.dot_general(w_new, z, (((0,), (0,)), ((), ())),
                            preferred_element_type=jnp.float32)               # (N,M)
    mem_new = mem + outer / B

    # --- outputs ---------------------------------------------------------------
    hc_out_ref[...] = jnp.concatenate([h_new, c_new], axis=1)   # (B, 2C) lane-dense
    w_out_ref[...] = w_new
    z_out_ref[...] = z
    xmean_out_ref[...] = x_mean
    mem_out_ref[...] = mem_new
    elbo_out_ref[...] = elbo


# ---------------------------------------------------------------------------
# Wrapper (single fused pallas_call, full-array blocks, no grid — everything
# fits comfortably in VMEM at these sizes on v5e/v6e/v7x)
# ---------------------------------------------------------------------------
@jax.jit
def modelcell_forward(X, state, params):
    latent, h, c, w_prev, mem = state
    (w_lstm, b_lstm, w_fc, b_fc,
     w_enc, b_enc, wmu, bmu, wlv, blv, wd, bd, wo, bo) = params

    hc, w_new, z, x_gen_mean, mem_new, elbo = pl.pallas_call(
        modelcell_kernel,
        out_shape=(jax.ShapeDtypeStruct((B, 2 * C), jnp.float32),
                   jax.ShapeDtypeStruct((B, N), jnp.float32),
                   jax.ShapeDtypeStruct((B, M), jnp.float32),
                   jax.ShapeDtypeStruct((B, W), jnp.float32),
                   jax.ShapeDtypeStruct((N, M), jnp.float32),
                   jax.ShapeDtypeStruct((1, 1), jnp.float32)),
    )(X, latent, h, c, w_prev, mem,
      w_lstm, b_lstm, w_fc, b_fc,
      w_enc, b_enc, wmu, bmu, wlv, blv, wd, bd, wo, bo)

    h_new = hc[:, :C]
    c_new = hc[:, C:]
    new_state = (z, h_new, c_new, w_new, mem_new)
    return elbo[0, 0], x_gen_mean, new_state


def init_params(key, stdv=0.1):
    ks = jax.random.split(key, 14)
    nrm = lambda k, shape: stdv * jax.random.normal(k, shape, dtype=jnp.float32)
    return (
        nrm(ks[0], (M + C, 4 * C)),  # combined LSTM [W_ih; W_hh]
        nrm(ks[1], (1, 4 * C)),      # LSTM bias (b_ih + b_hh combined)
        nrm(ks[2], (C, AP)),         # fc1 weight
        nrm(ks[3], (1, AP)),         # fc1 bias
        nrm(ks[4], (M + W, H)),      # encoder W (combined [read; X] parts)
        nrm(ks[5], (1, H)),          # encoder bias
        nrm(ks[6], (H, M)),          # mu head
        nrm(ks[7], (1, M)),
        nrm(ks[8], (H, M)),          # logvar head
        nrm(ks[9], (1, M)),
        nrm(ks[10], (M, H)),         # decoder W
        nrm(ks[11], (1, H)),
        nrm(ks[12], (H, W)),         # output head
        nrm(ks[13], (1, W)),
    )


def init_state(key):
    latent = jnp.zeros((B, M), jnp.float32)
    h = jnp.zeros((B, C), jnp.float32)
    c = jnp.zeros((B, C), jnp.float32)
    w_prev = jnp.full((B, N), 1.0 / N, jnp.float32)
    mem = 0.05 * jax.random.normal(key, (N, M), dtype=jnp.float32)
    return (latent, h, c, w_prev, mem)


if __name__ == "__main__":
    key = jax.random.PRNGKey(0)
    k_par, k_mem, k_x = jax.random.split(key, 3)

    params = init_params(k_par)
    state = init_state(k_mem)
    X = jax.random.normal(k_x, (B, W), dtype=jnp.float32)

    elbo, x_gen_mean, new_state = modelcell_forward(X, state, params)
    jax.block_until_ready((elbo, x_gen_mean, new_state))

    assert x_gen_mean.shape == (B, W)
    assert elbo.shape == ()
    assert new_state[0].shape == (B, M)          # latent (z)
    assert new_state[1].shape == (B, C)          # h
    assert new_state[2].shape == (B, C)          # c
    assert new_state[3].shape == (B, N)          # read weights
    assert new_state[4].shape == (N, M)          # memory
    assert bool(jnp.isfinite(elbo))
    print("KERNEL_OK")
</pallas_src>

<mosaic_0001>
module attributes {stable_mosaic.version = 11 : i64} {
  func.func @modelcell_kernel(%arg0: memref<2x8xf32, #tpu.memory_space<vmem>>, %arg1: memref<2x32xf32, #tpu.memory_space<vmem>>, %arg2: memref<2x64xf32, #tpu.memory_space<vmem>>, %arg3: memref<2x64xf32, #tpu.memory_space<vmem>>, %arg4: memref<2x16xf32, #tpu.memory_space<vmem>>, %arg5: memref<16x32xf32, #tpu.memory_space<vmem>>, %arg6: memref<96x256xf32, #tpu.memory_space<vmem>>, %arg7: memref<1x256xf32, #tpu.memory_space<vmem>>, %arg8: memref<64x38xf32, #tpu.memory_space<vmem>>, %arg9: memref<1x38xf32, #tpu.memory_space<vmem>>, %arg10: memref<40x32xf32, #tpu.memory_space<vmem>>, %arg11: memref<1x32xf32, #tpu.memory_space<vmem>>, %arg12: memref<32x32xf32, #tpu.memory_space<vmem>>, %arg13: memref<1x32xf32, #tpu.memory_space<vmem>>, %arg14: memref<32x32xf32, #tpu.memory_space<vmem>>, %arg15: memref<1x32xf32, #tpu.memory_space<vmem>>, %arg16: memref<32x32xf32, #tpu.memory_space<vmem>>, %arg17: memref<1x32xf32, #tpu.memory_space<vmem>>, %arg18: memref<32x8xf32, #tpu.memory_space<vmem>>, %arg19: memref<1x8xf32, #tpu.memory_space<vmem>>, %arg20: memref<2x128xf32, #tpu.memory_space<vmem>>, %arg21: memref<2x16xf32, #tpu.memory_space<vmem>>, %arg22: memref<2x32xf32, #tpu.memory_space<vmem>>, %arg23: memref<2x8xf32, #tpu.memory_space<vmem>>, %arg24: memref<16x32xf32, #tpu.memory_space<vmem>>, %arg25: memref<1x1xf32, #tpu.memory_space<vmem>>) attributes {dimension_semantics = [], scalar_prefetch = 0 : i64, scratch_operands = 0 : i64, tpu.core_type = #tpu.core_type<tc>} {
    %c0 = arith.constant 0 : index
    %c0_0 = arith.constant 0 : index
    %0 = vector.load %arg1[%c0, %c0_0] : memref<2x32xf32, #tpu.memory_space<vmem>>, vector<2x32xf32>
    %c0_1 = arith.constant 0 : index
    %c0_2 = arith.constant 0 : index
    %1 = vector.load %arg2[%c0_1, %c0_2] : memref<2x64xf32, #tpu.memory_space<vmem>>, vector<2x64xf32>
    %c0_3 = arith.constant 0 : index
    %c0_4 = arith.constant 0 : index
    %2 = vector.load %arg3[%c0_3, %c0_4] : memref<2x64xf32, #tpu.memory_space<vmem>>, vector<2x64xf32>
    %c0_5 = arith.constant 0 : index
    %c0_6 = arith.constant 0 : index
    %3 = vector.load %arg5[%c0_5, %c0_6] : memref<16x32xf32, #tpu.memory_space<vmem>>, vector<16x32xf32>
    %c0_7 = arith.constant 0 : index
    %c0_8 = arith.constant 0 : index
    %4 = vector.load %arg0[%c0_7, %c0_8] : memref<2x8xf32, #tpu.memory_space<vmem>>, vector<2x8xf32>
    %5 = tpu.concatenate %0, %1 in 1 : vector<2x32xf32>, vector<2x64xf32> -> vector<2x96xf32>
    %c0_9 = arith.constant 0 : index
    %c0_10 = arith.constant 0 : index
    %6 = vector.load %arg6[%c0_9, %c0_10] : memref<96x256xf32, #tpu.memory_space<vmem>>, vector<96x256xf32>
    %cst = arith.constant dense<0.000000e+00> : vector<2x256xf32>
    %7 = tpu.matmul %5, %6, %cst {dimension_numbers = #tpu.dot_dimension_numbers<[1], [0], [0], [1], [0, 0, 1, 1], [], []>} : vector<2x96xf32>, vector<96x256xf32>, vector<2x256xf32> -> vector<2x256xf32>
    %c0_11 = arith.constant 0 : index
    %c0_12 = arith.constant 0 : index
    %8 = vector.load %arg7[%c0_11, %c0_12] : memref<1x256xf32, #tpu.memory_space<vmem>>, vector<1x256xf32>
    %9 = vector.broadcast %8 : vector<1x256xf32> to vector<2x256xf32>
    %10 = arith.addf %7, %9 : vector<2x256xf32>
    %11 = vector.extract_strided_slice %10 {offsets = [0, 0], sizes = [2, 64], strides = [1, 1]} : vector<2x256xf32> to vector<2x64xf32>
    %12 = arith.negf %11 : vector<2x64xf32>
    %13 = math.exp %12 : vector<2x64xf32>
    %cst_13 = arith.constant 1.000000e+00 : f32
    %14 = vector.broadcast %cst_13 : f32 to vector<2x64xf32>
    %15 = arith.addf %14, %13 : vector<2x64xf32>
    %16 = arith.divf %14, %15 : vector<2x64xf32>
    %17 = vector.extract_strided_slice %10 {offsets = [0, 64], sizes = [2, 64], strides = [1, 1]} : vector<2x256xf32> to vector<2x64xf32>
    %18 = arith.negf %17 : vector<2x64xf32>
    %19 = math.exp %18 : vector<2x64xf32>
    %cst_14 = arith.constant 1.000000e+00 : f32
    %20 = vector.broadcast %cst_14 : f32 to vector<2x64xf32>
    %21 = arith.addf %20, %19 : vector<2x64xf32>
    %22 = arith.divf %20, %21 : vector<2x64xf32>
    %23 = vector.extract_strided_slice %10 {offsets = [0, 128], sizes = [2, 64], strides = [1, 1]} : vector<2x256xf32> to vector<2x64xf32>
    %24 = math.tanh %23 : vector<2x64xf32>
    %25 = vector.extract_strided_slice %10 {offsets = [0, 192], sizes = [2, 64], strides = [1, 1]} : vector<2x256xf32> to vector<2x64xf32>
    %26 = arith.negf %25 : vector<2x64xf32>
    %27 = math.exp %26 : vector<2x64xf32>
    %cst_15 = arith.constant 1.000000e+00 : f32
    %28 = vector.broadcast %cst_15 : f32 to vector<2x64xf32>
    %29 = arith.addf %28, %27 : vector<2x64xf32>
    %30 = arith.divf %28, %29 : vector<2x64xf32>
    %31 = arith.mulf %22, %2 : vector<2x64xf32>
    %32 = arith.mulf %16, %24 : vector<2x64xf32>
    %33 = arith.addf %31, %32 : vector<2x64xf32>
    %34 = math.tanh %33 : vector<2x64xf32>
    %35 = arith.mulf %30, %34 : vector<2x64xf32>
    %c0_16 = arith.constant 0 : index
    %c0_17 = arith.constant 0 : index
    %36 = vector.load %arg8[%c0_16, %c0_17] : memref<64x38xf32, #tpu.memory_space<vmem>>, vector<64x38xf32>
    %cst_18 = arith.constant dense<0.000000e+00> : vector<2x38xf32>
    %37 = tpu.matmul %35, %36, %cst_18 {dimension_numbers = #tpu.dot_dimension_numbers<[1], [0], [0], [1], [0, 0, 1, 1], [], []>} : vector<2x64xf32>, vector<64x38xf32>, vector<2x38xf32> -> vector<2x38xf32>
    %c0_19 = arith.constant 0 : index
    %c0_20 = arith.constant 0 : index
    %38 = vector.load %arg9[%c0_19, %c0_20] : memref<1x38xf32, #tpu.memory_space<vmem>>, vector<1x38xf32>
    %39 = vector.broadcast %38 : vector<1x38xf32> to vector<2x38xf32>
    %40 = arith.addf %37, %39 : vector<2x38xf32>
    %41 = vector.extract_strided_slice %40 {offsets = [0, 0], sizes = [2, 32], strides = [1, 1]} : vector<2x38xf32> to vector<2x32xf32>
    %42 = math.tanh %41 : vector<2x32xf32>
    %43 = vector.extract_strided_slice %40 {offsets = [0, 32], sizes = [2, 1], strides = [1, 1]} : vector<2x38xf32> to vector<2x1xf32>
    %cst_21 = arith.constant 0.000000e+00 : f32
    %44 = vector.broadcast %cst_21 : f32 to vector<2x1xf32>
    %45 = arith.maximumf %43, %44 : vector<2x1xf32>
    %46 = vector.broadcast %cst_21 : f32 to vector<2x1xf32>
    %47 = arith.subf %43, %46 : vector<2x1xf32>
    %48 = arith.cmpf one, %47, %47 : vector<2x1xf32>
    %49 = vector.broadcast %cst_21 : f32 to vector<2x1xf32>
    %50 = arith.addf %43, %49 : vector<2x1xf32>
    %51 = math.absf %47 : vector<2x1xf32>
    %cst_22 = arith.constant 0.000000e+00 : f32
    %52 = vector.broadcast %cst_22 : f32 to vector<2x1xf32>
    %53 = arith.subf %52, %51 : vector<2x1xf32>
    %54 = math.exp %53 : vector<2x1xf32>
    %55 = math.log1p %54 : vector<2x1xf32>
    %56 = arith.addf %45, %55 : vector<2x1xf32>
    %57 = arith.select %48, %50, %56 : vector<2x1xi1>, vector<2x1xf32>
    %58 = vector.extract_strided_slice %40 {offsets = [0, 33], sizes = [2, 1], strides = [1, 1]} : vector<2x38xf32> to vector<2x1xf32>
    %59 = arith.negf %58 : vector<2x1xf32>
    %60 = math.exp %59 : vector<2x1xf32>
    %cst_23 = arith.constant 1.000000e+00 : f32
    %61 = vector.broadcast %cst_23 : f32 to vector<2x1xf32>
    %62 = arith.addf %61, %60 : vector<2x1xf32>
    %63 = arith.divf %61, %62 : vector<2x1xf32>
    %64 = vector.extract_strided_slice %40 {offsets = [0, 34], sizes = [2, 3], strides = [1, 1]} : vector<2x38xf32> to vector<2x3xf32>
    %cst_24 = arith.constant dense<0xFF800000> : vector<2xf32>
    %65 = vector.multi_reduction <maximumf>, %64, %cst_24 [1] : vector<2x3xf32> to vector<2xf32>
    %cst_25 = arith.constant 0xFF800000 : f32
    %66 = vector.broadcast %cst_25 : f32 to vector<2xf32>
    %67 = arith.maximumf %66, %65 : vector<2xf32>
    %68 = vector.shape_cast %67 : vector<2xf32> to vector<2x1xf32>
    %69 = vector.broadcast %68 : vector<2x1xf32> to vector<2x3xf32>
    %70 = arith.subf %64, %69 : vector<2x3xf32>
    %71 = math.exp %70 : vector<2x3xf32>
    %cst_26 = arith.constant dense<0.000000e+00> : vector<2xf32>
    %72 = vector.multi_reduction <add>, %71, %cst_26 [1] : vector<2x3xf32> to vector<2xf32>
    %73 = vector.shape_cast %72 : vector<2xf32> to vector<2x1xf32>
    %74 = vector.broadcast %73 : vector<2x1xf32> to vector<2x3xf32>
    %75 = arith.divf %71, %74 : vector<2x3xf32>
    %76 = vector.extract_strided_slice %40 {offsets = [0, 37], sizes = [2, 1], strides = [1, 1]} : vector<2x38xf32> to vector<2x1xf32>
    %cst_27 = arith.constant 0.000000e+00 : f32
    %77 = vector.broadcast %cst_27 : f32 to vector<2x1xf32>
    %78 = arith.maximumf %76, %77 : vector<2x1xf32>
    %79 = vector.broadcast %cst_27 : f32 to vector<2x1xf32>
    %80 = arith.subf %76, %79 : vector<2x1xf32>
    %81 = arith.cmpf one, %80, %80 : vector<2x1xf32>
    %82 = vector.broadcast %cst_27 : f32 to vector<2x1xf32>
    %83 = arith.addf %76, %82 : vector<2x1xf32>
    %84 = math.absf %80 : vector<2x1xf32>
    %cst_28 = arith.constant 0.000000e+00 : f32
    %85 = vector.broadcast %cst_28 : f32 to vector<2x1xf32>
    %86 = arith.subf %85, %84 : vector<2x1xf32>
    %87 = math.exp %86 : vector<2x1xf32>
    %88 = math.log1p %87 : vector<2x1xf32>
    %89 = arith.addf %78, %88 : vector<2x1xf32>
    %90 = arith.select %81, %83, %89 : vector<2x1xi1>, vector<2x1xf32>
    %cst_29 = arith.constant 1.000000e+00 : f32
    %91 = vector.broadcast %cst_29 : f32 to vector<2x1xf32>
    %92 = arith.addf %91, %90 : vector<2x1xf32>
    %93 = arith.mulf %42, %42 : vector<2x32xf32>
    %cst_30 = arith.constant dense<0.000000e+00> : vector<2xf32>
    %94 = vector.multi_reduction <add>, %93, %cst_30 [1] : vector<2x32xf32> to vector<2xf32>
    %95 = vector.shape_cast %94 : vector<2xf32> to vector<2x1xf32>
    %96 = math.sqrt %95 : vector<2x1xf32>
    %cst_31 = arith.constant 9.99999993E-9 : f32
    %97 = vector.broadcast %cst_31 : f32 to vector<2x1xf32>
    %98 = arith.addf %96, %97 : vector<2x1xf32>
    %99 = vector.broadcast %98 : vector<2x1xf32> to vector<2x32xf32>
    %100 = arith.divf %42, %99 : vector<2x32xf32>
    %101 = arith.mulf %3, %3 : vector<16x32xf32>
    %cst_32 = arith.constant dense<0.000000e+00> : vector<16xf32>
    %102 = vector.multi_reduction <add>, %101, %cst_32 [1] : vector<16x32xf32> to vector<16xf32>
    %103 = vector.shape_cast %102 : vector<16xf32> to vector<16x1xf32>
    %104 = math.sqrt %103 : vector<16x1xf32>
    %cst_33 = arith.constant 9.99999993E-9 : f32
    %105 = vector.broadcast %cst_33 : f32 to vector<16x1xf32>
    %106 = arith.addf %104, %105 : vector<16x1xf32>
    %107 = vector.broadcast %106 : vector<16x1xf32> to vector<16x32xf32>
    %108 = arith.divf %3, %107 : vector<16x32xf32>
    %cst_34 = arith.constant dense<0.000000e+00> : vector<2x16xf32>
    %109 = tpu.matmul %100, %108, %cst_34 {dimension_numbers = #tpu.dot_dimension_numbers<[1], [1], [0], [0], [0, 0, 1, 0], [], []>} : vector<2x32xf32>, vector<16x32xf32>, vector<2x16xf32> -> vector<2x16xf32>
    %110 = vector.broadcast %57 : vector<2x1xf32> to vector<2x16xf32>
    %111 = arith.mulf %110, %109 : vector<2x16xf32>
    %cst_35 = arith.constant dense<0xFF800000> : vector<2xf32>
    %112 = vector.multi_reduction <maximumf>, %111, %cst_35 [1] : vector<2x16xf32> to vector<2xf32>
    %cst_36 = arith.constant 0xFF800000 : f32
    %113 = vector.broadcast %cst_36 : f32 to vector<2xf32>
    %114 = arith.maximumf %113, %112 : vector<2xf32>
    %115 = vector.shape_cast %114 : vector<2xf32> to vector<2x1xf32>
    %116 = vector.broadcast %115 : vector<2x1xf32> to vector<2x16xf32>
    %117 = arith.subf %111, %116 : vector<2x16xf32>
    %118 = math.exp %117 : vector<2x16xf32>
    %cst_37 = arith.constant dense<0.000000e+00> : vector<2xf32>
    %119 = vector.multi_reduction <add>, %118, %cst_37 [1] : vector<2x16xf32> to vector<2xf32>
    %120 = vector.shape_cast %119 : vector<2xf32> to vector<2x1xf32>
    %121 = vector.broadcast %120 : vector<2x1xf32> to vector<2x16xf32>
    %122 = arith.divf %118, %121 : vector<2x16xf32>
    %123 = vector.broadcast %63 : vector<2x1xf32> to vector<2x16xf32>
    %124 = arith.mulf %123, %122 : vector<2x16xf32>
    %cst_38 = arith.constant 1.000000e+00 : f32
    %125 = vector.broadcast %cst_38 : f32 to vector<2x1xf32>
    %126 = arith.subf %125, %63 : vector<2x1xf32>
    %c0_39 = arith.constant 0 : index
    %c0_40 = arith.constant 0 : index
    %127 = vector.load %arg4[%c0_39, %c0_40] : memref<2x16xf32, #tpu.memory_space<vmem>>, vector<2x16xf32>
    %128 = vector.broadcast %126 : vector<2x1xf32> to vector<2x16xf32>
    %129 = arith.mulf %128, %127 : vector<2x16xf32>
    %130 = arith.addf %124, %129 : vector<2x16xf32>
    %131 = vector.extract_strided_slice %75 {offsets = [0, 0], sizes = [2, 1], strides = [1, 1]} : vector<2x3xf32> to vector<2x1xf32>
    %c1_i32 = arith.constant 1 : i32
    %132 = tpu.dynamic_rotate %130 by %c1_i32 dim 1 : vector<2x16xf32>, i32 -> vector<2x16xf32>
    %133 = vector.broadcast %131 : vector<2x1xf32> to vector<2x16xf32>
    %134 = arith.mulf %133, %132 : vector<2x16xf32>
    %135 = vector.extract_strided_slice %75 {offsets = [0, 1], sizes = [2, 1], strides = [1, 1]} : vector<2x3xf32> to vector<2x1xf32>
    %136 = vector.broadcast %135 : vector<2x1xf32> to vector<2x16xf32>
    %137 = arith.mulf %136, %130 : vector<2x16xf32>
    %138 = arith.addf %134, %137 : vector<2x16xf32>
    %139 = vector.extract_strided_slice %75 {offsets = [0, 2], sizes = [2, 1], strides = [1, 1]} : vector<2x3xf32> to vector<2x1xf32>
    %c15_i32 = arith.constant 15 : i32
    %140 = tpu.dynamic_rotate %130 by %c15_i32 dim 1 : vector<2x16xf32>, i32 -> vector<2x16xf32>
    %141 = vector.broadcast %139 : vector<2x1xf32> to vector<2x16xf32>
    %142 = arith.mulf %141, %140 : vector<2x16xf32>
    %143 = arith.addf %138, %142 : vector<2x16xf32>
    %cst_41 = arith.constant 9.99999993E-9 : f32
    %144 = vector.broadcast %cst_41 : f32 to vector<2x16xf32>
    %145 = arith.addf %143, %144 : vector<2x16xf32>
    %146 = math.log %145 : vector<2x16xf32>
    %147 = vector.broadcast %92 : vector<2x1xf32> to vector<2x16xf32>
    %148 = arith.mulf %147, %146 : vector<2x16xf32>
    %149 = math.exp %148 : vector<2x16xf32>
    %cst_42 = arith.constant dense<0.000000e+00> : vector<2xf32>
    %150 = vector.multi_reduction <add>, %149, %cst_42 [1] : vector<2x16xf32> to vector<2xf32>
    %151 = vector.shape_cast %150 : vector<2xf32> to vector<2x1xf32>
    %cst_43 = arith.constant 9.99999993E-9 : f32
    %152 = vector.broadcast %cst_43 : f32 to vector<2x1xf32>
    %153 = arith.addf %151, %152 : vector<2x1xf32>
    %154 = vector.broadcast %153 : vector<2x1xf32> to vector<2x16xf32>
    %155 = arith.divf %149, %154 : vector<2x16xf32>
    %cst_44 = arith.constant dense<0.000000e+00> : vector<2x32xf32>
    %156 = tpu.matmul %155, %3, %cst_44 {dimension_numbers = #tpu.dot_dimension_numbers<[1], [0], [0], [1], [0, 0, 1, 1], [], []>} : vector<2x16xf32>, vector<16x32xf32>, vector<2x32xf32> -> vector<2x32xf32>
    %157 = tpu.concatenate %156, %4 in 1 : vector<2x32xf32>, vector<2x8xf32> -> vector<2x40xf32>
    %c0_45 = arith.constant 0 : index
    %c0_46 = arith.constant 0 : index
    %158 = vector.load %arg10[%c0_45, %c0_46] : memref<40x32xf32, #tpu.memory_space<vmem>>, vector<40x32xf32>
    %cst_47 = arith.constant dense<0.000000e+00> : vector<2x32xf32>
    %159 = tpu.matmul %157, %158, %cst_47 {dimension_numbers = #tpu.dot_dimension_numbers<[1], [0], [0], [1], [0, 0, 1, 1], [], []>} : vector<2x40xf32>, vector<40x32xf32>, vector<2x32xf32> -> vector<2x32xf32>
    %c0_48 = arith.constant 0 : index
    %c0_49 = arith.constant 0 : index
    %160 = vector.load %arg11[%c0_48, %c0_49] : memref<1x32xf32, #tpu.memory_space<vmem>>, vector<1x32xf32>
    %161 = vector.broadcast %160 : vector<1x32xf32> to vector<2x32xf32>
    %162 = arith.addf %159, %161 : vector<2x32xf32>
    %163 = math.tanh %162 : vector<2x32xf32>
    %c0_50 = arith.constant 0 : index
    %c0_51 = arith.constant 0 : index
    %164 = vector.load %arg12[%c0_50, %c0_51] : memref<32x32xf32, #tpu.memory_space<vmem>>, vector<32x32xf32>
    %cst_52 = arith.constant dense<0.000000e+00> : vector<2x32xf32>
    %165 = tpu.matmul %163, %164, %cst_52 {dimension_numbers = #tpu.dot_dimension_numbers<[1], [0], [0], [1], [0, 0, 1, 1], [], []>} : vector<2x32xf32>, vector<32x32xf32>, vector<2x32xf32> -> vector<2x32xf32>
    %c0_53 = arith.constant 0 : index
    %c0_54 = arith.constant 0 : index
    %166 = vector.load %arg13[%c0_53, %c0_54] : memref<1x32xf32, #tpu.memory_space<vmem>>, vector<1x32xf32>
    %167 = vector.broadcast %166 : vector<1x32xf32> to vector<2x32xf32>
    %168 = arith.addf %165, %167 : vector<2x32xf32>
    %c0_55 = arith.constant 0 : index
    %c0_56 = arith.constant 0 : index
    %169 = vector.load %arg14[%c0_55, %c0_56] : memref<32x32xf32, #tpu.memory_space<vmem>>, vector<32x32xf32>
    %cst_57 = arith.constant dense<0.000000e+00> : vector<2x32xf32>
    %170 = tpu.matmul %163, %169, %cst_57 {dimension_numbers = #tpu.dot_dimension_numbers<[1], [0], [0], [1], [0, 0, 1, 1], [], []>} : vector<2x32xf32>, vector<32x32xf32>, vector<2x32xf32> -> vector<2x32xf32>
    %c0_58 = arith.constant 0 : index
    %c0_59 = arith.constant 0 : index
    %171 = vector.load %arg15[%c0_58, %c0_59] : memref<1x32xf32, #tpu.memory_space<vmem>>, vector<1x32xf32>
    %172 = vector.broadcast %171 : vector<1x32xf32> to vector<2x32xf32>
    %173 = arith.addf %170, %172 : vector<2x32xf32>
    %c0_60 = arith.constant 0 : index
    %c0_61 = arith.constant 0 : index
    %174 = vector.load %arg16[%c0_60, %c0_61] : memref<32x32xf32, #tpu.memory_space<vmem>>, vector<32x32xf32>
    %cst_62 = arith.constant dense<0.000000e+00> : vector<2x32xf32>
    %175 = tpu.matmul %168, %174, %cst_62 {dimension_numbers = #tpu.dot_dimension_numbers<[1], [0], [0], [1], [0, 0, 1, 1], [], []>} : vector<2x32xf32>, vector<32x32xf32>, vector<2x32xf32> -> vector<2x32xf32>
    %c0_63 = arith.constant 0 : index
    %c0_64 = arith.constant 0 : index
    %176 = vector.load %arg17[%c0_63, %c0_64] : memref<1x32xf32, #tpu.memory_space<vmem>>, vector<1x32xf32>
    %177 = vector.broadcast %176 : vector<1x32xf32> to vector<2x32xf32>
    %178 = arith.addf %175, %177 : vector<2x32xf32>
    %179 = math.tanh %178 : vector<2x32xf32>
    %c0_65 = arith.constant 0 : index
    %c0_66 = arith.constant 0 : index
    %180 = vector.load %arg18[%c0_65, %c0_66] : memref<32x8xf32, #tpu.memory_space<vmem>>, vector<32x8xf32>
    %cst_67 = arith.constant dense<0.000000e+00> : vector<2x8xf32>
    %181 = tpu.matmul %179, %180, %cst_67 {dimension_numbers = #tpu.dot_dimension_numbers<[1], [0], [0], [1], [0, 0, 1, 1], [], []>} : vector<2x32xf32>, vector<32x8xf32>, vector<2x8xf32> -> vector<2x8xf32>
    %c0_68 = arith.constant 0 : index
    %c0_69 = arith.constant 0 : index
    %182 = vector.load %arg19[%c0_68, %c0_69] : memref<1x8xf32, #tpu.memory_space<vmem>>, vector<1x8xf32>
    %183 = vector.broadcast %182 : vector<1x8xf32> to vector<2x8xf32>
    %184 = arith.addf %181, %183 : vector<2x8xf32>
    %185 = arith.subf %4, %184 : vector<2x8xf32>
    %186 = arith.mulf %185, %185 : vector<2x8xf32>
    %cst_70 = arith.constant dense<0.000000e+00> : vector<2xf32>
    %187 = vector.multi_reduction <add>, %186, %cst_70 [1] : vector<2x8xf32> to vector<2xf32>
    %188 = vector.shape_cast %187 : vector<2xf32> to vector<2x1xf32>
    %cst_71 = arith.constant -5.000000e-01 : f32
    %189 = vector.broadcast %cst_71 : f32 to vector<2x1xf32>
    %190 = arith.mulf %189, %188 : vector<2x1xf32>
    %191 = math.exp %173 : vector<2x32xf32>
    %192 = arith.mulf %168, %168 : vector<2x32xf32>
    %193 = arith.addf %191, %192 : vector<2x32xf32>
    %cst_72 = arith.constant 1.000000e+00 : f32
    %194 = vector.broadcast %cst_72 : f32 to vector<2x32xf32>
    %195 = arith.subf %193, %194 : vector<2x32xf32>
    %196 = arith.subf %195, %173 : vector<2x32xf32>
    %cst_73 = arith.constant dense<0.000000e+00> : vector<2xf32>
    %197 = vector.multi_reduction <add>, %196, %cst_73 [1] : vector<2x32xf32> to vector<2xf32>
    %198 = vector.shape_cast %197 : vector<2xf32> to vector<2x1xf32>
    %cst_74 = arith.constant 5.000000e-01 : f32
    %199 = vector.broadcast %cst_74 : f32 to vector<2x1xf32>
    %200 = arith.mulf %199, %198 : vector<2x1xf32>
    %201 = arith.subf %190, %200 : vector<2x1xf32>
    %cst_75 = arith.constant dense<0.000000e+00> : vector<1xf32>
    %202 = vector.multi_reduction <add>, %201, %cst_75 [0] : vector<2x1xf32> to vector<1xf32>
    %203 = vector.shape_cast %202 : vector<1xf32> to vector<1x1xf32>
    %cst_76 = arith.constant 2.000000e+00 : f32
    %204 = vector.broadcast %cst_76 : f32 to vector<1x1xf32>
    %205 = arith.divf %203, %204 : vector<1x1xf32>
    %cst_77 = arith.constant dense<0.000000e+00> : vector<16x32xf32>
    %206 = tpu.matmul %155, %168, %cst_77 {dimension_numbers = #tpu.dot_dimension_numbers<[0], [0], [1], [1], [0, 1, 1, 1], [], []>} : vector<2x16xf32>, vector<2x32xf32>, vector<16x32xf32> -> vector<16x32xf32>
    %cst_78 = arith.constant 2.000000e+00 : f32
    %207 = vector.broadcast %cst_78 : f32 to vector<16x32xf32>
    %208 = arith.divf %206, %207 : vector<16x32xf32>
    %209 = arith.addf %3, %208 : vector<16x32xf32>
    %210 = tpu.concatenate %35, %33 in 1 : vector<2x64xf32>, vector<2x64xf32> -> vector<2x128xf32>
    %c0_79 = arith.constant 0 : index
    %c0_80 = arith.constant 0 : index
    %211 = vector.load %arg20[%c0_79, %c0_80] : memref<2x128xf32, #tpu.memory_space<vmem>>, vector<2x128xf32>
    tpu.vector_store %arg20[%c0_79, %c0_80], %210 {strides = array<i32>} : memref<2x128xf32, #tpu.memory_space<vmem>>, vector<2x128xf32>,
    %c0_81 = arith.constant 0 : index
    %c0_82 = arith.constant 0 : index
    %212 = vector.load %arg21[%c0_81, %c0_82] : memref<2x16xf32, #tpu.memory_space<vmem>>, vector<2x16xf32>
    tpu.vector_store %arg21[%c0_81, %c0_82], %155 {strides = array<i32>} : memref<2x16xf32, #tpu.memory_space<vmem>>, vector<2x16xf32>,
    %c0_83 = arith.constant 0 : index
    %c0_84 = arith.constant 0 : index
    %213 = vector.load %arg22[%c0_83, %c0_84] : memref<2x32xf32, #tpu.memory_space<vmem>>, vector<2x32xf32>
    tpu.vector_store %arg22[%c0_83, %c0_84], %168 {strides = array<i32>} : memref<2x32xf32, #tpu.memory_space<vmem>>, vector<2x32xf32>,
    %c0_85 = arith.constant 0 : index
    %c0_86 = arith.constant 0 : index
    %214 = vector.load %arg23[%c0_85, %c0_86] : memref<2x8xf32, #tpu.memory_space<vmem>>, vector<2x8xf32>
    tpu.vector_store %arg23[%c0_85, %c0_86], %184 {strides = array<i32>} : memref<2x8xf32, #tpu.memory_space<vmem>>, vector<2x8xf32>,
    %c0_87 = arith.constant 0 : index
    %c0_88 = arith.constant 0 : index
    %215 = vector.load %arg24[%c0_87, %c0_88] : memref<16x32xf32, #tpu.memory_space<vmem>>, vector<16x32xf32>
    tpu.vector_store %arg24[%c0_87, %c0_88], %209 {strides = array<i32>} : memref<16x32xf32, #tpu.memory_space<vmem>>, vector<16x32xf32>,
    %c0_89 = arith.constant 0 : index
    %c0_90 = arith.constant 0 : index
    %216 = vector.load %arg25[%c0_89, %c0_90] : memref<1x1xf32, #tpu.memory_space<vmem>>, vector<1x1xf32>
    tpu.vector_store %arg25[%c0_89, %c0_90], %205 {strides = array<i32>} : memref<1x1xf32, #tpu.memory_space<vmem>>, vector<1x1xf32>,
    return
  }
}

</mosaic_0001>

<bundles_post_ra>
// kernel: modelcell_forward.1
= control target key start
LH: loop header
LB: loop body
LE: loop exit
PB: predicated region body
PF: predicated region fallthrough
CT: control target
= control target key end

     0   :  { %s2489_s0 = inlined_call_operand.vmem [shape: f32[2,8], index: 0, kind: input, shape index: {}]   ;;  %s2490_s1 = inlined_call_operand.vmem [shape: f32[2,32], index: 1, kind: input, shape index: {}]   ;;  %s2491_s2 = inlined_call_operand.hbm [shape: f32[2,64], index: 2, kind: input, shape index: {}]   ;;  %s2492_s3 = inlined_call_operand.hbm [shape: f32[2,64], index: 3, kind: input, shape index: {}]   ;;  %s2493_s4 = inlined_call_operand.hbm [shape: f32[2,16], index: 4, kind: input, shape index: {}]   ;;  %s2494_s5 = inlined_call_operand.hbm [shape: f32[16,32], index: 5, kind: input, shape index: {}]   ;;  %s2495_s6 = inlined_call_operand.vmem [shape: f32[96,256], index: 6, kind: input, shape index: {}]   ;;  %s2496_s7 = inlined_call_operand.hbm [shape: f32[1,256], index: 7, kind: input, shape index: {}]   ;;  %s2497_s8 = inlined_call_operand.vmem [shape: f32[64,38], index: 8, kind: input, shape index: {}]   ;;  %s2498_s9 = inlined_call_operand.hbm [shape: f32[1,38], index: 9, kind: input, shape index: {}]   ;;  %s2499_s10 = inlined_call_operand.vmem [shape: f32[40,32], index: 10, kind: input, shape index: {}]   ;;  %s2500_s11 = inlined_call_operand.hbm [shape: f32[1,32], index: 11, kind: input, shape index: {}]   ;;  %s2501_s12 = inlined_call_operand.hbm [shape: f32[32,32], index: 12, kind: input, shape index: {}]   ;;  %s2502_s13 = inlined_call_operand.vmem [shape: f32[1,32], index: 13, kind: input, shape index: {}]   ;;  %s2503_s14 = inlined_call_operand.hbm [shape: f32[32,32], index: 14, kind: input, shape index: {}]   ;;  %s2504_s15 = inlined_call_operand.vmem [shape: f32[1,32], index: 15, kind: input, shape index: {}]   ;;  %s2505_s16 = inlined_call_operand.hbm [shape: f32[32,32], index: 16, kind: input, shape index: {}]   ;;  %s2506_s17 = inlined_call_operand.vmem [shape: f32[1,32], index: 17, kind: input, shape index: {}]   ;;  %s2507_s18 = inlined_call_operand.vmem [shape: f32[32,8], index: 18, kind: input, shape index: {}]   ;;  %s2508_s19 = inlined_call_operand.vmem [shape: f32[1,8], index: 19, kind: input, shape index: {}]   ;;  %s2509_s20 = inlined_call_operand.vmem [shape: f32[2,128], index: 20, kind: output, shape index: {0}]   ;;  %s2510_s21 = inlined_call_operand.hbm [shape: f32[2,16], index: 21, kind: output, shape index: {1}]   ;;  %s2511_s22 = inlined_call_operand.hbm [shape: f32[2,32], index: 22, kind: output, shape index: {2}]   ;;  %s2512_s23 = inlined_call_operand.hbm [shape: f32[2,8], index: 23, kind: output, shape index: {3}]   ;;  %s2513_s24 = inlined_call_operand.hbm [shape: f32[16,32], index: 24, kind: output, shape index: {4}]   ;;  %s2514_s25 = inlined_call_operand.hbm [shape: f32[1,1], index: 25, kind: output, shape index: {5}]  }
   0x1   :  { %2517 = sst [smem:[#allocation35_spill]] %s2489_s0 }
   0x2   :  { %2518 = sst [smem:[#allocation36_spill]] %s2490_s1 }
   0x3   :  { %2519 = sst [smem:[#allocation37_spill]] %s2491_s2 }
   0x4   :  { %2520 = sst [smem:[#allocation38_spill]] %s2492_s3 }
   0x5   :  { %2521 = sst [smem:[#allocation39_spill]] %s2493_s4 }
   0x6   :  { %2522 = sst [smem:[#allocation40_spill]] %s2494_s5 }
   0x7   :  { %2523 = sst [smem:[#allocation41_spill]] %s2495_s6 }
   0x8   :  { %2524 = sst [smem:[#allocation42_spill]] %s2496_s7 }
   0x9   :  { %2525 = sst [smem:[#allocation43_spill]] %s2497_s8 }
   0xa   :  { %2526 = sst [smem:[#allocation44_spill]] %s2498_s9 }
   0xb   :  { %31 = vsyncpa [#allocation3], 0 }
   0xc   :  { %32 = vsyncpa [#allocation6], 0 }
   0xd   :  { %33 = vsyncpa [#allocation9], 0 }
   0xe   :  { %34 = vsyncpa [#allocation12], 0 }
   0xf   :  { %35 = vsyncpa [#allocation15], 0 }
  0x10   :  { %36 = vsyncpa [#allocation18], 0 }
  0x11   :  { %37 = vsyncpa [#allocation4], 0 }
  0x12   :  { %38 = vsyncpa [#allocation21], 0 }
  0x13   :  { %39 = vsyncpa [#allocation24], 0  ;;  %s2005_s29 = smov [#allocation5]   ;;  %s2006_s6 = smov [#allocation8]  }
  0x14   :  { %s60_s2 = sshll.u32 %s2005_s29, 4  ;;  %s79_s30 = sshll.u32 %s2006_s6, 4  ;;  %s61_s2 = int_to_ptr.vmem [resolvable:$true] %s60_s2  ;;  %s80_s30 = int_to_ptr.vmem [resolvable:$true] %s79_s30 }
  0x15   :  { %s1695_s7 = scalar_lea.vmem %s61_s2, 32  ;;  %p1700_p1 = scmp.lt.s32.totalorder %s61_s2, %s61_s2 }
  0x16   :  { %p1696_p0 = scmp.ne.s32.totalorder %s61_s2, %s1695_s7  ;;  %p1701_p2 = scmp.lt.s32.totalorder %s1695_s7, %s1695_s7 }
  0x18   :  { %p1702_p3 = por %p1701_p2, %p1700_p1 }
  0x1a   :  { %p1703_p4 = pnand %p1702_p3, %p1696_p0 }
  0x1c   :  { %1706 = shalt.err (!%p1703_p4)
}
  0x1d   :  { %s2527_s1 = sld [smem:[#allocation38_spill]]  ;;  %s1715_s8 = scalar_lea.vmem %s80_s30, 256 }
  0x1e   :  { %p1716_p5 = scmp.ne.s32.totalorder %s80_s30, %s1715_s8  ;;  %p1720_p6 = scmp.lt.s32.totalorder %s80_s30, %s80_s30 }
  0x1f   :  { %p1721_p7 = scmp.lt.s32.totalorder %s1715_s8, %s1715_s8 }
  0x21   :  { %p1722_p8 = por %p1721_p7, %p1720_p6 }
  0x23   :  { %63 = dma.hbm_to_vmem [thread:$0]  %s2527_s1, 32, %s61_s2, [#allocation6]  }
  0x24   :  { %p1723_p9 = pnand %p1722_p8, %p1716_p5 }
  0x26   :  { %1726 = shalt.err (!%p1723_p9)
}
  0x27   :  { %s2007_s27 = smov 128   ;;  %s2008_s4 = smov 8  }
  0x28   :  { %s2528_s5 = sld [smem:[#allocation40_spill]]  ;;  %s2009_s0 = smov [#allocation11]  }
  0x29   :  { %s106_s29 = sshll.u32 %s2009_s0, 4  ;;  %s2010_s6 = smov [#allocation14]   ;;  %s107_s29 = int_to_ptr.vmem [resolvable:$true] %s106_s29 }
  0x2a   :  { %s127_s2 = sshll.u32 %s2010_s6, 4  ;;  %s1735_s7 = scalar_lea.vmem %s107_s29, 16  ;;  %s128_s2 = int_to_ptr.vmem [resolvable:$true] %s127_s2 }
  0x2b   :  { %p1736_p10 = scmp.ne.s32.totalorder %s107_s29, %s1735_s7  ;;  %s1739_s3 = scalar_lea.vmem %s107_s29, 32 }
  0x2c   :  { %p1740_p11 = scmp.lt.s32.totalorder %s107_s29, %s107_s29  ;;  %p1741_p12 = scmp.lt.s32.totalorder %s1739_s3, %s1735_s7 }
  0x2e   :  { %85 = dma.hbm_to_vmem [thread:$0]  %s2528_s5, 256, %s80_s30, [#allocation9], %s2007_s27, %s2007_s27, %s2008_s4  }
  0x2f   :  { %p1742_p13 = por %p1741_p12, %p1740_p11 }
  0x31   :  { %p1743_p0 = pnand %p1742_p13, %p1736_p10 }
  0x33   :  { %1746 = shalt.err (!%p1743_p0)
}
  0x34   :  { %s2529_s8 = sld [smem:[#allocation44_spill]]  ;;  %s1755_s28 = scalar_lea.vmem %s128_s2, 512 }
  0x35   :  { %p1756_p1 = scmp.ne.s32.totalorder %s128_s2, %s1755_s28  ;;  %p1760_p2 = scmp.lt.s32.totalorder %s128_s2, %s128_s2 }
  0x36   :  { %p1761_p3 = scmp.lt.s32.totalorder %s1755_s28, %s1755_s28 }
  0x38   :  { %p1762_p4 = por %p1761_p3, %p1760_p2 }
  0x3a   :  { %109 = dma.hbm_to_vmem [thread:$0]  %s2529_s8, 16, %s107_s29, [#allocation12]  }
  0x3b   :  { %p1763_p5 = pnand %p1762_p4, %p1756_p1 }
  0x3d   :  { %1766 = shalt.err (!%p1763_p5)
}
  0x3e   :  { %133 = dma.hbm_to_vmem [thread:$0]  %s2501_s12, 512, %s128_s2, [#allocation15], %s2007_s27, %s2007_s27, %s2008_s4  }
  0x3f   :  { %s2011_s5 = smov [#allocation2]   ;;  %s2012_s6 = smov [#allocation7]  }
  0x40   :  { %s50_s0 = sshll.u32 %s2011_s5, 4  ;;  %s70_s7 = sshll.u32 %s2012_s6, 4  ;;  %s51_s0 = int_to_ptr.vmem [resolvable:$true] %s50_s0  ;;  %s71_s7 = int_to_ptr.vmem [resolvable:$true] %s70_s7 }
  0x41   :  { %s1775_s29 = scalar_lea.vmem %s51_s0, 32  ;;  %p1780_p7 = scmp.lt.s32.totalorder %s51_s0, %s51_s0 }
  0x42   :  { %p1776_p6 = scmp.ne.s32.totalorder %s51_s0, %s1775_s29  ;;  %p1781_p8 = scmp.lt.s32.totalorder %s1775_s29, %s1775_s29 }
  0x44   :  { %p1782_p9 = por %p1781_p8, %p1780_p7 }
  0x46   :  { %p1783_p10 = pnand %p1782_p9, %p1776_p6 }
  0x48   :  { %1786 = shalt.err (!%p1783_p10)
}
  0x49   :  { %s2530_s1 = sld [smem:[#allocation37_spill]]  ;;  %s1795_s8 = scalar_lea.vmem %s71_s7, 32 }
  0x4a   :  { %p1796_p11 = scmp.ne.s32.totalorder %s71_s7, %s1795_s8  ;;  %p1800_p12 = scmp.lt.s32.totalorder %s71_s7, %s71_s7 }
  0x4b   :  { %p1801_p13 = scmp.lt.s32.totalorder %s1795_s8, %s1795_s8 }
  0x4d   :  { %p1802_p0 = por %p1801_p13, %p1800_p12 }
  0x4f   :  { %53 = dma.hbm_to_vmem [thread:$0]  %s2530_s1, 32, %s51_s0, [#allocation3]  }
  0x50   :  { %p1803_p1 = pnand %p1802_p0, %p1796_p11 }
  0x52   :  { %1806 = shalt.err (!%p1803_p1)
}
  0x53   :  { %s2531_s28 = sld [smem:[#allocation39_spill]]  ;;  %s2013_s30 = smov [#allocation10]  }
  0x54   :  { %s94_s9 = sshll.u32 %s2013_s30, 4  ;;  %s2014_s5 = smov [#allocation13]   ;;  %s95_s9 = int_to_ptr.vmem [resolvable:$true] %s94_s9 }
  0x55   :  { %s118_s6 = sshll.u32 %s2014_s5, 4  ;;  %s1815_s29 = scalar_lea.vmem %s95_s9, 32  ;;  %s119_s6 = int_to_ptr.vmem [resolvable:$true] %s118_s6 }
  0x56   :  { %p1816_p2 = scmp.ne.s32.totalorder %s95_s9, %s1815_s29  ;;  %p1820_p3 = scmp.lt.s32.totalorder %s95_s9, %s95_s9 }
  0x57   :  { %p1821_p4 = scmp.lt.s32.totalorder %s1815_s29, %s1815_s29 }
  0x59   :  { %73 = dma.hbm_to_vmem [thread:$0]  %s2531_s28, 32, %s71_s7, [#allocation6]  }
  0x5a   :  { %p1822_p5 = por %p1821_p4, %p1820_p3 }
  0x5c   :  { %p1823_p6 = pnand %p1822_p5, %p1816_p2 }
  0x5e   :  { %1826 = shalt.err (!%p1823_p6)
}
  0x5f   :  { %s2532_s26 = sld [smem:[#allocation42_spill]]  ;;  %s1835_s1 = scalar_lea.vmem %s119_s6, 16 }
  0x60   :  { %p1836_p7 = scmp.ne.s32.totalorder %s119_s6, %s1835_s1  ;;  %s1839_s7 = scalar_lea.vmem %s119_s6, 32 }
  0x61   :  { %p1840_p8 = scmp.lt.s32.totalorder %s119_s6, %s119_s6  ;;  %p1841_p9 = scmp.lt.s32.totalorder %s1839_s7, %s1835_s1 }
  0x63   :  { %p1842_p10 = por %p1841_p9, %p1840_p8 }
  0x65   :  { %97 = dma.hbm_to_vmem [thread:$0]  %s2532_s26, 32, %s95_s9, [#allocation9]  }
  0x66   :  { %p1843_p11 = pnand %p1842_p10, %p1836_p7 }
  0x68   :  { %1846 = shalt.err (!%p1843_p11)
}
  0x69   :  { %121 = dma.hbm_to_vmem [thread:$0]  %s2500_s11, 16, %s119_s6, [#allocation12]  }
  0x6a   :  { %s2015_s2 = smov [#allocation16]   ;;  %s2016_s30 = smov [#allocation17]  }
  0x6b   :  { %s141_s28 = sshll.u32 %s2015_s2, 4  ;;  %s155_s5 = sshll.u32 %s2016_s30, 4  ;;  %s142_s28 = int_to_ptr.vmem [resolvable:$true] %s141_s28  ;;  %s156_s5 = int_to_ptr.vmem [resolvable:$true] %s155_s5 }
  0x6c   :  { %s1855_s29 = scalar_lea.vmem %s142_s28, 512  ;;  %p1860_p13 = scmp.lt.s32.totalorder %s142_s28, %s142_s28 }
  0x6d   :  { %p1856_p12 = scmp.ne.s32.totalorder %s142_s28, %s1855_s29  ;;  %p1861_p0 = scmp.lt.s32.totalorder %s1855_s29, %s1855_s29 }
  0x6f   :  { %p1862_p1 = por %p1861_p0, %p1860_p13 }
  0x71   :  { %p1863_p2 = pnand %p1862_p1, %p1856_p12 }
  0x73   :  { %1866 = shalt.err (!%p1863_p2)
}
  0x74   :  { %147 = dma.hbm_to_vmem [thread:$0]  %s2503_s14, 512, %s142_s28, [#allocation15], %s2007_s27, %s2007_s27, %s2008_s4  }
  0x75   :  { %s1875_s11 = scalar_lea.vmem %s156_s5, 512  ;;  %p1880_p4 = scmp.lt.s32.totalorder %s156_s5, %s156_s5 }
  0x76   :  { %p1876_p3 = scmp.ne.s32.totalorder %s156_s5, %s1875_s11  ;;  %p1881_p5 = scmp.lt.s32.totalorder %s1875_s11, %s1875_s11 }
  0x78   :  { %p1882_p6 = por %p1881_p5, %p1880_p4 }
  0x7a   :  { %p1883_p7 = pnand %p1882_p6, %p1876_p3 }
  0x7c   :  { %1886 = shalt.err (!%p1883_p7)
}
  0x7d   :  { %161 = dma.hbm_to_vmem [thread:$0]  %s2505_s16, 512, %s156_s5, [#allocation18], %s2007_s27, %s2007_s27, %s2008_s4  }
  0x7e   :  { %1987 = dma.done.wait [#allocation3], 32  }
  0x7f   :  { %1988 = vsyncadd [#allocation3], 4294967264 }
  0x80   :  { %1989 = dma.done.wait [#allocation6], 64  }
  0x81   :  { %1990 = vsyncadd [#allocation6], 4294967232 }
  0x82   :  { %1991 = dma.done.wait [#allocation9], 288  }
  0x83   :  { %1992 = vsyncadd [#allocation9], 4294967008 }
  0x84   :  { %1993 = dma.done.wait [#allocation12], 32  }
  0x85   :  { %1994 = vsyncadd [#allocation12], 4294967264 }
  0x86   :  { %1995 = dma.done.wait [#allocation15], 1024  }
  0x87   :  { %1996 = vsyncadd [#allocation15], 4294966272 }
  0x88   :  { %1997 = dma.done.wait [#allocation18], 512  }
  0x89   :  { %1998 = vsyncadd [#allocation18], 4294966784  ;;  %v2017_v0 = vmov 0.0   ;;  %v199_v1 = vld [vmem:[#allocation2] sm:$0x3]  ;;  %s2533_s26 = sld [smem:[#allocation41_spill]]  ;;  %v236_v30 = vlaneseq }
  0x8a   :  { %314 = vmatprep.mubr.f32.mxu0 %v2017_v0  ;;  %1499 = vmatprep.subr.mxu1 %v2017_v0  ;;  %s2018_s8 = smov 32   ;;  %v200_v13 = vld [vmem:[#allocation5] sm:$0x3]  ;;  %s2019_s29 = smov 64   ;;  %vm208_vm0 = vcmask 261120   ;;  %vm246_vm1 = vcmask 785408  }
  0x8b   :  { %205 = vrot.lane.b32.xlu0 %v199_v1, %s2018_s8  ;;  %s2534_s30 = sld [smem:[#allocation36_spill]]  ;;  %v237_v31 = vshrl.u32 %v236_v30, 7  ;;  %v234_v33 = vld [vmem:[#allocation10] sm:$0x3]  ;;  %vm2020_vm2 = vmmov 0   ;;  %v2327_v62 = vld [vmem:[#allocation8 + $0x8] sm:$0xff] }
  0x8c   :  { %s2535_s9 = sld [smem:[#allocation43_spill]]  ;;  %1515 = vmatprep.mubr.msk.f32.mxu1 %vm2020_vm2, %v2017_v0  ;;  %v497_v63 = vmul.f32 %v2327_v62, %v2327_v62  ;;  %v2332_v1 = vld [vmem:[#allocation8] sm:$0xff]  ;;  %vm365_vm3 = vcmask 523264   ;;  %vm463_vm4 = vcmask 296208   ;;  %vm482_vm6 = vcmask 254976   ;;  %s2029_s11 = smov 15  }
  0x8d   :  { %v238_v32 = vsub.s32 0, %v237_v31  ;;  %v242_v38 = vsub.s32 1, %v237_v31  ;;  %vm609_vm14 = vcmask 123904   ;;  %vm474_vm15 = vcmask 17408   ;;  %s2030_s6 = smov 14   ;;  %s2031_s3 = smov 113  }
  0x8f   :  { %v233_v2 = vld [vmem:[%s2533_s26 + $0xb8] sm:$0xff]  ;;  %v232_v3 = vld [vmem:[%s2533_s26 + $0xb0] sm:$0xff]  ;;  %v231_v4 = vld [vmem:[%s2533_s26 + $0xa8] sm:$0xff]  ;;  %335 = vrot.lane.b32.xlu0 %v200_v13, %s2019_s29  ;;  %v239_v34 = vrot.slane %v234_v33, %v238_v32  ;;  %v243_v39 = vrot.slane %v234_v33, %v242_v38 }
  0x90   :  { %258 = vmatprep.subr.mxu0 %v233_v2  ;;  %v230_v5 = vld [vmem:[%s2533_s26 + $0xa0] sm:$0xff]  ;;  %v229_v6 = vld [vmem:[%s2533_s26 + $0x98] sm:$0xff]  ;;  %v228_v7 = vld [vmem:[%s2533_s26 + $0x90] sm:$0xff]  ;;  %v501_v2 = vsel %vm208_vm0, %v497_v63, 0.0 }
  0x91   :  { %259 = vmatpush1.msra.mxu0 %v232_v3  ;;  %v227_v8 = vld [vmem:[%s2533_s26 + $0x88] sm:$0xff]  ;;  %v226_v9 = vld [vmem:[%s2533_s26 + $0x80] sm:$0xff]  ;;  %v225_v10 = vld [vmem:[%s2533_s26 + $0x78] sm:$0xff] }
  0x92   :  { %260 = vmatprep.subr.mxu0 %v231_v4  ;;  %v224_v11 = vld [vmem:[%s2533_s26 + $0x70] sm:$0xff]  ;;  %v223_v12 = vld [vmem:[%s2533_s26 + $0x68] sm:$0xff]  ;;  %v222_v14 = vld [vmem:[%s2533_s26 + $0x60] sm:$0xff] }
  0x93   :  { %261 = vmatpush1.msra.mxu0 %v230_v5  ;;  %v221_v15 = vld [vmem:[%s2533_s26 + $0x58] sm:$0xff]  ;;  %v220_v16 = vld [vmem:[%s2533_s26 + $0x50] sm:$0xff]  ;;  %v219_v17 = vld [vmem:[%s2533_s26 + $0x48] sm:$0xff] }
  0x94   :  { %262 = vmatprep.subr.mxu0 %v229_v6  ;;  %v218_v18 = vld [vmem:[%s2533_s26 + $0x40] sm:$0xff]  ;;  %v217_v19 = vld [vmem:[%s2533_s26 + $0x38] sm:$0xff]  ;;  %v216_v20 = vld [vmem:[%s2533_s26 + $0x30] sm:$0xff]  ;;  %v496_v6 = vmul.f32 %v2332_v1, %v2332_v1 }
  0x95   :  { %263 = vmatpush1.msra.mxu0 %v228_v7  ;;  %v215_v21 = vld [vmem:[%s2533_s26 + $0x28] sm:$0xff]  ;;  %v214_v22 = vld [vmem:[%s2533_s26 + $0x20] sm:$0xff]  ;;  %v213_v23 = vld [vmem:[%s2533_s26 + $0x18] sm:$0xff] }
  0x96   :  { %264 = vmatprep.subr.mxu0 %v227_v8  ;;  %v212_v24 = vld [vmem:[%s2533_s26 + $0x10] sm:$0xff]  ;;  %v211_v25 = vld [vmem:[%s2533_s26 + $0x8] sm:$0xff]  ;;  %v210_v26 = vld [vmem:[%s2533_s26] sm:$0xff]  ;;  %v498_v7 = vsel %vm208_vm0, %v496_v6, 0.0  ;;  %s2033_s26 = smov [#allocation23]  }
  0x97   :  { %265 = vmatpush1.msra.mxu0 %v226_v9  ;;  %v198_v27 = vld [vmem:[%s2534_s30] sm:$0x3]  ;;  %v354_v47 = vld [vmem:[%s2535_s9 + $0x38] sm:$0xff]  ;;  %v353_v48 = vld [vmem:[%s2535_s9 + $0x30] sm:$0xff]  ;;  %s1388_s5 = sshll.u32 %s2033_s26, 4  ;;  %s1389_s5 = int_to_ptr.vmem [resolvable:$true] %s1388_s5 }
  0x98   :  { %266 = vmatprep.subr.mxu0 %v225_v10  ;;  %1500 = vmatpush3.msra.mxu1 %v354_v47  ;;  %v352_v49 = vld [vmem:[%s2535_s9 + $0x28] sm:$0xff]  ;;  %v351_v50 = vld [vmem:[%s2535_s9 + $0x20] sm:$0xff]  ;;  %v350_v51 = vld [vmem:[%s2535_s9 + $0x18] sm:$0xff]  ;;  %v2021_v10 = vmov 32  }
  0x99   :  { %267 = vmatpush1.msra.mxu0 %v224_v11  ;;  %1501 = vmatprep.subr.mxu1 %v2017_v0  ;;  %v349_v52 = vld [vmem:[%s2535_s9 + $0x10] sm:$0xff]  ;;  %v348_v53 = vld [vmem:[%s2535_s9 + $0x8] sm:$0xff]  ;;  %v347_v54 = vld [vmem:[%s2535_s9] sm:$0xff]  ;;  %s2536_s9 = sld [smem:[#allocation35_spill]] }
  0x9a   :  { %268 = vmatprep.subr.mxu0 %v223_v12  ;;  %1502 = vmatpush3.msra.mxu1 %v353_v48  ;;  %v1434_v13 = vld [vmem:[#allocation11] ss:$0 sm:$0xff] }
  0x9b   :  { %269 = vmatpush1.msra.mxu0 %v222_v14  ;;  %1503 = vmatprep.subr.mxu1 %v2017_v0 }
  0x9c   :  { %270 = vmatprep.subr.mxu0 %v221_v15  ;;  %1504 = vmatpush3.msra.mxu1 %v352_v49 }
  0x9d   :  { %271 = vmatpush1.msra.mxu0 %v220_v16  ;;  %1505 = vmatprep.subr.mxu1 %v2017_v0 }
  0x9e   :  { %272 = vmatprep.subr.mxu0 %v219_v17  ;;  %1506 = vmatpush3.msra.mxu1 %v351_v50 }
  0x9f   :  { %273 = vmatpush1.msra.mxu0 %v218_v18  ;;  %1507 = vmatprep.subr.mxu1 %v2017_v0 }
  0xa0   :  { %274 = vmatprep.subr.mxu0 %v217_v19  ;;  %1508 = vmatpush3.msra.mxu1 %v350_v51 }
  0xa1   :  { %275 = vmatpush1.msra.mxu0 %v216_v20  ;;  %1509 = vmatprep.subr.mxu1 %v2017_v0 }
  0xa2   :  { %276 = vmatprep.subr.mxu0 %v215_v21  ;;  %1510 = vmatpush3.msra.mxu1 %v349_v52 }
  0xa3   :  { %277 = vmatpush1.msra.mxu0 %v214_v22  ;;  %1511 = vmatprep.subr.mxu1 %v2017_v0 }
  0xa4   :  { %278 = vmatprep.subr.mxu0 %v213_v23  ;;  %1512 = vmatpush3.msra.mxu1 %v348_v53 }
  0xa5   :  { %279 = vmatpush1.msra.mxu0 %v212_v24  ;;  %1513 = vmatprep.subr.mxu1 %v2017_v0 }
  0xa6   :  { %280 = vmatprep.subr.mxu0 %v211_v25  ;;  %1514 = vmatpush3.msra.mxu1 %v347_v54 }
  0xa7   :  { %281 = vmatpush1.msra.mxu0 %v210_v26  ;;  %1518 = vmatprep.subr.mxu1 %v2017_v0 }
  0xa8   :  { %1525 = vmatprep.subr.mxu0 %v2017_v0  ;;  %1626 = vset.pattern.permute.xlu0 %v2021_v10 }
  0xae   :  { %502 = vadd.xlane.f32.xlu0 %v501_v2 }
  0xfd   :  { %v206_v28 = vpop.permute.xlu0 %205 }
  0xfe   :  { %v209_v29 = vsel %vm208_vm0, %v198_v27, %v206_v28 }
  0xff   :  { %1431 = vmatmul.mubr.msk.f32.vlgmr.msra.gmra.mxu0 %vm246_vm1, %v209_v29  ;;  %vm636_vm1 = vcmask 1047680  }
 0x100   :  { %1529 = vmatprep.mubr.msk.f32.mxu0 %vm2020_vm2, %v2017_v0  ;;  %1526 = vmatpush3.msra.mxu0 %v2327_v62 }
 0x101   :  { %v336_v57 = vpop.permute.xlu0 %335  ;;  %1527 = vmatprep.subr.mxu0 %v2017_v0 }
 0x102   :  { %1528 = vmatpush3.msra.mxu0 %v2332_v1 }
 0x103   :  { %1545 = vmatprep.subr.mxu0 %v2017_v0 }
 0x137   :  { %v503_v11 = vpop.xlane.xlu0 %502 }
 0x138   :  { %vm513_vm5 = vcmp.eq.f32.partialorder %v503_v11, inf  ;;  %v516_v25 = vand.u32 2147483648, %v503_v11  ;;  %vm515_vm7 = vcmp.eq.f32.partialorder %v503_v11, 0.0 }
 0x1bf   :  { %v316_v35 = vpop.f32.mrf.mxu0 }
 0x1c0   :  { %v317_v36 = vadd.f32 %v316_v35, %v239_v34 }
 0x1c1   :  { %v318_v40 = vpop.f32.mrf.mxu0 }
 0x1c2   :  { %v1432_v37 = vmul.f32 -1.442695, %v317_v36  ;;  %v319_v41 = vadd.f32 %v318_v40, %v243_v39 }
 0x1c4   :  { %1633 = vpow2.f32 %v1432_v37  ;;  %v1433_v55 = vmul.f32 -1.442695, %v319_v41 }
 0x1c5   :  { %1635 = vtanh.f32 %v319_v41 }
 0x1d1   :  { %v1634_v42 = vpop.eup %1633 }
 0x1d2   :  { %v324_v43 = vadd.f32 1.0, %v1634_v42  ;;  %v1636_v44 = vpop.eup %1635 }
 0x1d4   :  { %1637 = vrcp.f32 %v324_v43 }
 0x1d5   :  { %1639 = vpow2.f32 %v1433_v55 }
 0x1e1   :  { %v1638_v45 = vpop.eup %1637 }
 0x1e2   :  { %v339_v46 = vmul.f32 %v1638_v45, %v1636_v44  ;;  %v1640_v56 = vpop.eup %1639  ;;  %v338_v59 = vmul.f32 %v1638_v45, %v336_v57 }
 0x1e3   :  { %v331_v58 = vadd.f32 1.0, %v1640_v56  ;;  %v2022_v56 = vmov 33  }
 0x1e4   :  { %341 = vrot.lane.b32.xlu1 %v339_v46, %s2019_s29 }
 0x1e5   :  { %1641 = vrcp.f32 %v331_v58 }
 0x1f2   :  { %v1642_v3 = vpop.eup %1641 }
 0x256   :  { %v342_v60 = vpop.permute.xlu1 %341 }
 0x257   :  { %v344_v61 = vadd.f32 %v342_v60, %v338_v59 }
 0x259   :  { %1643 = vtanh.f32 %v344_v61 }
 0x25a   :  { %1645 = vrsqrt.f32 %v503_v11 }
 0x266   :  { %v1644_v4 = vpop.eup %1643 }
 0x267   :  { %v346_v5 = vmul.f32 %v1644_v4, %v1642_v3  ;;  %v1646_v21 = vpop.eup %1645 }
 0x268   :  { %v512_v23 = vmul.f32 %v1646_v21, %v503_v11 }
 0x269   :  { %363 = vrot.lane.b32.xlu1 %v346_v5, %s2019_s29  ;;  %s2025_s29 = smov 16  }
 0x26a   :  { %v514_v27 = vsel %vm513_vm5, %v503_v11, %v512_v23  ;;  %vm1253_vm5 = vcmask 15360  }
 0x26b   :  { %v517_v31 = vsel %vm515_vm7, %v516_v25, %v514_v27 }
 0x26c   :  { %v519_v35 = vadd.f32 1e-08, %v517_v31 }
 0x28d   :  { %499 = vadd.xlane.f32.xlu1 %v498_v7 }
 0x2db   :  { %v364_v8 = vpop.permute.xlu1 %363 }
 0x2dc   :  { %v1342_v9 = vsel %vm365_vm3, %v364_v8, %v344_v61  ;;  %1516 = vmatmul.mubr.msk.f32.vlgmr.msra.gmra.mxu1 %vm365_vm3, %v364_v8  ;;  %vm693_vm3 = vcmask 130048  }
 0x2dd   :  { %1343 = vst [vmem:[%s2509_s20] sm:$0x3] %v1342_v9  ;;  %1522 = vmatprep.mubr.msk.f32.mxu1 %vm2020_vm2, %v2017_v0  ;;  %s2023_s20 = smov 94  }
 0x316   :  { %v500_v12 = vpop.xlane.xlu1 %499 }
 0x317   :  { %1647 = vrsqrt.f32 %v500_v12  ;;  %vm506_vm8 = vcmp.eq.f32.partialorder %v500_v12, inf  ;;  %v509_v32 = vand.u32 2147483648, %v500_v12  ;;  %vm508_vm9 = vcmp.eq.f32.partialorder %v500_v12, 0.0 }
 0x324   :  { %v1648_v24 = vpop.eup %1647 }
 0x325   :  { %v505_v28 = vmul.f32 %v1648_v24, %v500_v12 }
 0x327   :  { %v507_v33 = vsel %vm506_vm8, %v500_v12, %v505_v28  ;;  %v628_v28 = vld [vmem:[#allocation7] sm:$0x3] }
 0x328   :  { %v510_v37 = vsel %vm508_vm9, %v509_v32, %v507_v33 }
 0x329   :  { %v518_v38 = vadd.f32 1e-08, %v510_v37  ;;  %v2028_v37 = vmov 37  }
 0x39c   :  { %v434_v14 = vpop.f32.mrf.mxu1 }
 0x39d   :  { %v2347_v15 = vadd.f32 %v1434_v13, %v434_v14 }
 0x39e   :  { %v1517_v16 = vpop.f32.mrf.mxu1 }
 0x39f   :  { %v442_v17 = vand.u32 2147483647, %v2347_v15  ;;  %v464_v18 = vsel %vm463_vm4, %v2347_v15, -inf  ;;  %1649 = vtanh.f32 %v2347_v15  ;;  %v1436_v22 = vmul.f32 -1.442695, %v2347_v15 }
 0x3a0   :  { %465 = vmax.xlane.f32.xlu1 %v464_v18  ;;  %v439_v48 = vmax.f32 %v2347_v15, 0.0  ;;  %vm440_vm11 = vcmp.ne.f32.partialorder %v2347_v15, %v2347_v15  ;;  %vm783_vm4 = vcmask 326656  }
 0x3a1   :  { %v443_v19 = vsub.f32 0.0, %v442_v17 }
 0x3a3   :  { %v444_v20 = vmul.f32 1.442695, %v443_v19 }
 0x3a5   :  { %1651 = vpow2.f32 %v444_v20 }
 0x3a6   :  { %1653 = vpow2.f32 %v1436_v22  ;;  %v2024_v22 = vmov 35  }
 0x3a7   :  { %1628 = vset.pattern.permute.xlu1 %v2024_v22  ;;  %v858_v22 = vld [vmem:[#allocation14] sm:$0xff] }
 0x3ac   :  { %v2353_v26 = vpop.eup %1649 }
 0x3ad   :  { %v481_v29 = vmul.f32 %v2353_v26, %v2353_v26 }
 0x3af   :  { %v483_v30 = vsel %vm482_vm6, %v481_v29, 0.0 }
 0x3b0   :  { %484 = vadd.xlane.f32.xlu0 %v483_v30 }
 0x3b2   :  { %v1652_v34 = vpop.eup %1651 }
 0x3b3   :  { %v446_v36 = vadd.f32 1.0, %v1652_v34  ;;  %v1654_v39 = vpop.eup %1653  ;;  %v449_v40 = vmul.f32 -0.5, %v1652_v34  ;;  %v452_v43 = vand.u32 2147483647, %v1652_v34 }
 0x3b4   :  { %v460_v41 = vadd.f32 1.0, %v1654_v39 }
 0x3b5   :  { %1655 = vlog2.f32 %v446_v36  ;;  %v450_v42 = vadd.f32 1.0, %v449_v40  ;;  %vm453_vm10 = vcmp.lt.f32.partialorder %v452_v43, 0.0004427343  ;;  %v2027_v36 = vmov 34  }
 0x3b6   :  { %1657 = vrcp.f32 %v519_v35  ;;  %v2026_v35 = vmov 36  }
 0x3b7   :  { %1659 = vrcp.f32 %v518_v38  ;;  %v451_v47 = vmul.f32 %v1652_v34, %v450_v42 }
 0x3b8   :  { %1661 = vrcp.f32 %v460_v41 }
 0x3c2   :  { %v1656_v44 = vpop.eup %1655 }
 0x3c3   :  { %v1658_v45 = vpop.eup %1657  ;;  %v448_v46 = vmul.f32 0.6931472, %v1656_v44 }
 0x3c4   :  { %v523_v51 = vmul.f32 %v1658_v45, %v2327_v62  ;;  %v1660_v52 = vpop.eup %1659 }
 0x3c5   :  { %v454_v49 = vsel %vm453_vm10, %v451_v47, %v448_v46  ;;  %v521_v54 = vmul.f32 %v1660_v52, %v2332_v1  ;;  %v1662_v55 = vpop.eup %1661 }
 0x3c6   :  { %v455_v50 = vadd.f32 %v454_v49, %v439_v48  ;;  %1519 = vmatpush3.xpose.msk.msra.mxu1 %vm208_vm0, %v523_v51  ;;  %v627_v57 = vsub.f32 1.0, %v1662_v55 }
 0x3c7   :  { %1520 = vmatprep.subr.mxu1 %v2017_v0 }
 0x3c8   :  { %v2363_v53 = vsel %vm440_vm11, %v2347_v15, %v455_v50 }
 0x3c9   :  { %605 = vperm.xlu0 %1626, %v2363_v53   ;;  %v480_v46 = vadd.f32 1.0, %v2363_v53 }
 0x3ca   :  { %1521 = vmatpush3.xpose.msk.msra.mxu1 %vm208_vm0, %v521_v54 }
 0x3cb   :  { %1532 = vmatprep.subr.mxu1 %v2017_v0 }
 0x3cd   :  { %1627 = vset.pattern.permute.xlu0 %v2022_v56 }
 0x3ce   :  { %623 = vperm.xlu0 %1627, %v1662_v55  }
 0x3d2   :  { %631 = vperm.xlu0 %1627, %v627_v57  }
 0x429   :  { %v466_v6 = vpop.xlane.xlu1 %465 }
 0x42a   :  { %v467_v7 = vsub.f32 %v2347_v15, %v466_v6  ;;  %v772_v6 = vld [vmem:[%s2499_s10 + $0x8] sm:$0xff] }
 0x42c   :  { %v468_v12 = vmul.f32 1.442695, %v467_v7 }
 0x439   :  { %v485_v58 = vpop.xlane.xlu0 %484 }
 0x43a   :  { %1663 = vrsqrt.f32 %v485_v58  ;;  %vm488_vm12 = vcmp.eq.f32.partialorder %v485_v58, inf  ;;  %v491_v61 = vand.u32 2147483648, %v485_v58  ;;  %vm490_vm13 = vcmp.eq.f32.partialorder %v485_v58, 0.0 }
 0x444   :  { %v606_v8 = vpop.permute.xlu0 %605 }
 0x447   :  { %v1664_v59 = vpop.eup %1663 }
 0x448   :  { %v487_v60 = vmul.f32 %v1664_v59, %v485_v58 }
 0x449   :  { %v624_v23 = vpop.permute.xlu0 %623 }
 0x44a   :  { %v489_v63 = vsel %vm488_vm12, %v485_v58, %v487_v60 }
 0x44b   :  { %v492_v2 = vsel %vm490_vm13, %v491_v61, %v489_v63 }
 0x44c   :  { %v493_v3 = vadd.f32 1e-08, %v492_v2 }
 0x44d   :  { %v632_v24 = vpop.permute.xlu0 %631 }
 0x44e   :  { %1665 = vrcp.f32 %v493_v3  ;;  %v634_v30 = vmul.f32 %v632_v24, %v628_v28  ;;  %v775_v3 = vld [vmem:[%s2499_s10 + $0x20] sm:$0xff]  ;;  %v1441_v24 = vld [vmem:[#allocation13] ss:$0 sm:$0xff] }
 0x44f   :  { %1667 = vpow2.f32 %v468_v12  ;;  %v1026_v28 = vld [vmem:[#allocation17 + $0x18] sm:$0xff] }
 0x45b   :  { %v1666_v4 = vpop.eup %1665 }
 0x45c   :  { %v495_v5 = vmul.f32 %v1666_v4, %v2353_v26  ;;  %v1668_v14 = vpop.eup %1667  ;;  %v774_v4 = vld [vmem:[%s2499_s10 + $0x18] sm:$0xff] }
 0x45e   :  { %1523 = vmatmul.mubr.msk.f32.vlgmr.msra.gmra.mxu1 %vm208_vm0, %v495_v5  ;;  %v773_v5 = vld [vmem:[%s2499_s10 + $0x10] sm:$0xff] }
 0x45f   :  { %1542 = vmatprep.mubr.msk.f32.mxu1 %vm2020_vm2, %v2017_v0  ;;  %1533 = vmatpush3.msra.mxu1 %v775_v3 }
 0x460   :  { %1534 = vmatprep.subr.mxu1 %v2017_v0 }
 0x461   :  { %1535 = vmatpush3.msra.mxu1 %v774_v4 }
 0x462   :  { %1536 = vmatprep.subr.mxu1 %v2017_v0 }
 0x463   :  { %1537 = vmatpush3.msra.mxu1 %v773_v5 }
 0x464   :  { %1538 = vmatprep.subr.mxu1 %v2017_v0 }
 0x465   :  { %1539 = vmatpush3.msra.mxu1 %v772_v6 }
 0x466   :  { %1540 = vmatprep.subr.mxu1 %v2017_v0 }
 0x51e   :  { %v599_v9 = vpop.f32.mrf.mxu1 }
 0x51f   :  { %v608_v10 = vmul.f32 %v606_v8, %v599_v9  ;;  %v2400_v9 = vld [vmem:[%s2536_s9] sm:$0x3] }
 0x520   :  { %v1524_v11 = vpop.f32.mrf.mxu1 }
 0x521   :  { %v610_v13 = vsel %vm609_vm14, %v608_v10, -inf  ;;  %v771_v11 = vld [vmem:[%s2499_s10] sm:$0xff] }
 0x522   :  { %611 = vmax.xlane.f32.xlu1 %v610_v13  ;;  %1541 = vmatpush3.msra.mxu1 %v771_v11 }
 0x523   :  { %1556 = vmatprep.subr.mxu1 %v2017_v0 }
 0x533   :  { %471 = vrot.lane.b32.xlu1 %v1668_v14, %s2023_s20 }
 0x5ab   :  { %v612_v16 = vpop.xlane.xlu1 %611 }
 0x5ac   :  { %v613_v17 = vsub.f32 %v608_v10, %v612_v16 }
 0x5ae   :  { %v614_v18 = vmul.f32 1.442695, %v613_v17  ;;  %v861_v17 = vld [vmem:[#allocation14 + $0x18] sm:$0xff] }
 0x5af   :  { %v472_v19 = vpop.permute.xlu1 %471 }
 0x5b0   :  { %1669 = vpow2.f32 %v614_v18  ;;  %v475_v15 = vsel %vm474_vm15, %v472_v19, 0.0  ;;  %v945_v18 = vld [vmem:[#allocation16 + $0x18] sm:$0xff]  ;;  %v860_v19 = vld [vmem:[#allocation14 + $0x10] sm:$0xff] }
 0x5b1   :  { %476 = vadd.xlane.f32.xlu0 %v475_v15  ;;  %v944_v15 = vld [vmem:[#allocation16 + $0x10] sm:$0xff] }
 0x5bd   :  { %v1670_v20 = vpop.eup %1669 }
 0x5be   :  { %v616_v21 = vsel %vm609_vm14, %v1670_v20, 0.0 }
 0x5bf   :  { %617 = vadd.xlane.f32.xlu1 %v616_v21  ;;  %v943_v21 = vld [vmem:[#allocation16 + $0x8] sm:$0xff] }
 0x63a   :  { %v477_v26 = vpop.xlane.xlu0 %476 }
 0x648   :  { %v618_v25 = vpop.xlane.xlu1 %617 }
 0x649   :  { %1671 = vrcp.f32 %v618_v25 }
 0x64a   :  { %1673 = vrcp.f32 %v477_v26 }
 0x656   :  { %v1672_v27 = vpop.eup %1671 }
 0x657   :  { %v620_v29 = vmul.f32 %v1672_v27, %v1670_v20  ;;  %v1674_v33 = vpop.eup %1673  ;;  %v859_v20 = vld [vmem:[#allocation14 + $0x8] sm:$0xff] }
 0x658   :  { %v479_v34 = vmul.f32 %v1674_v33, %v1668_v14  ;;  %v1443_v33 = vld [vmem:[%s2502_s13] ss:$0 sm:$0xff] }
 0x659   :  { %v626_v31 = vmul.f32 %v624_v23, %v620_v29  ;;  %v942_v23 = vld [vmem:[#allocation16] sm:$0xff] }
 0x65b   :  { %v635_v32 = vadd.f32 %v634_v30, %v626_v31  ;;  %v1025_v30 = vld [vmem:[#allocation17 + $0x10] sm:$0xff]  ;;  %v1024_v31 = vld [vmem:[#allocation17 + $0x8] sm:$0xff] }
 0x65d   :  { %637 = vrot.lane.b32.xlu1 %v635_v32, %s2025_s29 }
 0x661   :  { %650 = vperm.xlu1 %1628, %v479_v34  }
 0x665   :  { %1629 = vset.pattern.permute.xlu1 %v2026_v35 }
 0x666   :  { %660 = vperm.xlu1 %1629, %v479_v34  }
 0x66a   :  { %1630 = vset.pattern.permute.xlu1 %v2027_v36 }
 0x66b   :  { %645 = vperm.xlu1 %1630, %v479_v34   ;;  %v1445_v34 = vld [vmem:[%s2504_s15] ss:$0 sm:$0xff] }
 0x66f   :  { %1631 = vset.pattern.permute.xlu1 %v2028_v37 }
 0x6cf   :  { %v638_v38 = vpop.permute.xlu1 %637 }
 0x6d0   :  { %v639_v39 = vsel %vm636_vm1, %v638_v38, %v635_v32 }
 0x6d1   :  { %640 = vrot.lane.b32.xlu0 %v639_v39, %s2025_s29 }
 0x6dc   :  { %v651_v40 = vpop.permute.xlu1 %650 }
 0x6dd   :  { %v653_v41 = vmul.f32 %v651_v40, %v635_v32 }
 0x6df   :  { %655 = vrot.lane.b32.xlu1 %v653_v41, %s2029_s11 }
 0x6e1   :  { %v661_v43 = vpop.permute.xlu1 %660 }
 0x6e6   :  { %v646_v47 = vpop.permute.xlu1 %645 }
 0x743   :  { %v641_v42 = vpop.permute.xlu0 %640 }
 0x744   :  { %v642_v44 = vsel %vm636_vm1, %v641_v42, %v635_v32  ;;  %v1023_v32 = vld [vmem:[#allocation17] sm:$0xff] }
 0x745   :  { %v663_v45 = vmul.f32 %v661_v43, %v642_v44  ;;  %v648_v49 = vmul.f32 %v646_v47, %v642_v44 }
 0x747   :  { %665 = vrot.lane.b32.xlu1 %v663_v45, %s2030_s6 }
 0x74b   :  { %674 = vperm.xlu1 %1631, %v480_v46  }
 0x751   :  { %v656_v48 = vpop.permute.xlu1 %655 }
 0x752   :  { %v658_v50 = vadd.f32 %v656_v48, %v648_v49  ;;  %v1111_v48 = vld [vmem:[%s2507_s18 + $0x18] sm:$0xff]  ;;  %v1110_v49 = vld [vmem:[%s2507_s18 + $0x10] sm:$0xff] }
 0x7b9   :  { %v666_v51 = vpop.permute.xlu1 %665 }
 0x7ba   :  { %v668_v52 = vadd.f32 %v666_v51, %v658_v50  ;;  %v1109_v50 = vld [vmem:[%s2507_s18 + $0x8] sm:$0xff]  ;;  %v1108_v51 = vld [vmem:[%s2507_s18] sm:$0xff] }
 0x7bc   :  { %v669_v54 = vadd.f32 1e-08, %v668_v52 }
 0x7be   :  { %1675 = vlog2.f32 %v669_v54 }
 0x7c6   :  { %v675_v57 = vpop.permute.xlu1 %674 }
 0x7cb   :  { %v1676_v55 = vpop.eup %1675 }
 0x7cc   :  { %v671_v56 = vmul.f32 0.6931472, %v1676_v55  ;;  %v1447_v55 = vld [vmem:[%s2506_s17] ss:$0 sm:$0xff]  ;;  %s2032_s17 = smov [#allocation20]  }
 0x7cd   :  { %s1369_s30 = sshll.u32 %s2032_s17, 4  ;;  %s1370_s30 = int_to_ptr.vmem [resolvable:$true] %s1369_s30 }
 0x7ce   :  { %v677_v58 = vmul.f32 %v675_v57, %v671_v56  ;;  %p1892_p9 = scmp.lt.s32.totalorder %s1370_s30, %s1370_s30 }
 0x7d0   :  { %v678_v59 = vmul.f32 1.442695, %v677_v58 }
 0x7d2   :  { %1677 = vpow2.f32 %v678_v59 }
 0x7df   :  { %v1678_v60 = vpop.eup %1677 }
 0x7e0   :  { %681 = vrot.lane.b32.xlu1 %v1678_v60, %s2031_s3 }
 0x852   :  { %v682_v61 = vpop.permute.xlu1 %681 }
 0x853   :  { %v684_v53 = vsel %vm609_vm14, %v682_v61, 0.0 }
 0x854   :  { %685 = vadd.xlane.f32.xlu1 %v684_v53 }
 0x8dd   :  { %v686_v63 = vpop.xlane.xlu1 %685 }
 0x8de   :  { %v687_v2 = vadd.f32 1e-08, %v686_v63 }
 0x8e0   :  { %1679 = vrcp.f32 %v687_v2 }
 0x8ed   :  { %v1680_v7 = vpop.eup %1679 }
 0x8ee   :  { %v689_v8 = vmul.f32 %v1680_v7, %v1678_v60 }
 0x8f0   :  { %691 = vrot.lane.b32.xlu0 %v689_v8, %s2031_s3 }
 0x8f4   :  { %767 = vrot.lane.b32.xlu0 %v2400_v9, %s2018_s8 }
 0x962   :  { %v692_v10 = vpop.permute.xlu0 %691 }
 0x963   :  { %1344 = vst.msk [vmem:[#allocation19] sm:$0x3] %vm609_vm14, %v692_v10  ;;  %1530 = vmatmul.mubr.msk.f32.vlgmr.msra.gmra.mxu0 %vm693_vm3, %v692_v10  ;;  %1221 = vxpose.xlu0.b32.start.end [1/1] (short) (narrow) %v692_v10, 16 }
 0x964   :  { %1553 = vmatprep.mubr.msk.f32.mxu0 %vm2020_vm2, %v2017_v0  ;;  %1546 = vmatpush3.msra.mxu0 %v861_v17 }
 0x965   :  { %1547 = vmatprep.subr.mxu0 %v2017_v0 }
 0x966   :  { %v768_v12 = vpop.permute.xlu0 %767  ;;  %1548 = vmatpush3.msra.mxu0 %v860_v19 }
 0x967   :  { %1549 = vmatprep.subr.mxu0 %v2017_v0 }
 0x968   :  { %1550 = vmatpush3.msra.mxu0 %v859_v20 }
 0x969   :  { %1551 = vmatprep.subr.mxu0 %v2017_v0 }
 0x96a   :  { %1552 = vmatpush3.msra.mxu0 %v858_v22 }
 0x96b   :  { %1567 = vmatprep.subr.mxu0 %v2017_v0 }
 0x98c   :  { %1632 = vset.pattern.permute.xlu0 %v2028_v37 }
 0x9df   :  { %v1237_v52 = vpop.trf.xlu0 }
 0x9e3   :  { %v1238_v54 = vpop.trf.xlu0 }
 0xa23   :  { %v762_v13 = vpop.f32.mrf.mxu0 }
 0xa24   :  { %v770_v14 = vsel %vm208_vm0, %v762_v13, %v768_v12 }
 0xa25   :  { %v1531_v16 = vpop.f32.mrf.mxu0  ;;  %1543 = vmatmul.mubr.msk.f32.vlgmr.msra.gmra.mxu1 %vm783_vm4, %v770_v14 }
 0xa26   :  { %1564 = vmatprep.mubr.msk.f32.mxu1 %vm2020_vm2, %v2017_v0  ;;  %1557 = vmatpush3.msra.mxu1 %v945_v18 }
 0xa27   :  { %1558 = vmatprep.subr.mxu1 %v2017_v0 }
 0xa28   :  { %1559 = vmatpush3.msra.mxu1 %v944_v15 }
 0xa29   :  { %1560 = vmatprep.subr.mxu1 %v2017_v0 }
 0xa2a   :  { %1561 = vmatpush3.msra.mxu1 %v943_v21 }
 0xa2b   :  { %1562 = vmatprep.subr.mxu1 %v2017_v0 }
 0xa2c   :  { %1563 = vmatpush3.msra.mxu1 %v942_v23 }
 0xa2d   :  { %1578 = vmatprep.subr.mxu1 %v2017_v0 }
 0xae5   :  { %v853_v25 = vpop.f32.mrf.mxu1 }
 0xae6   :  { %v854_v26 = vadd.f32 %v1441_v24, %v853_v25 }
 0xae7   :  { %v1544_v27 = vpop.f32.mrf.mxu1 }
 0xae8   :  { %1681 = vtanh.f32 %v854_v26 }
 0xaf5   :  { %v1682_v29 = vpop.eup %1681 }
 0xaf6   :  { %1554 = vmatmul.mubr.msk.f32.vlgmr.msra.gmra.mxu0 %vm208_vm0, %v1682_v29  ;;  %1565 = vmatmul.mubr.msk.f32.vlgmr.msra.gmra.mxu1 %vm208_vm0, %v1682_v29 }
 0xaf7   :  { %1568 = vmatpush3.msra.mxu0 %v1026_v28  ;;  %1575 = vmatprep.mubr.msk.f32.mxu0 %vm2020_vm2, %v2017_v0 }
 0xaf8   :  { %1569 = vmatprep.subr.mxu0 %v2017_v0  ;;  %1586 = vmatprep.mubr.msk.f32.mxu1 %vm2020_vm2, %v2017_v0  ;;  %vm1210_vm2 = vcmask 1041408  }
 0xaf9   :  { %1570 = vmatpush3.msra.mxu0 %v1025_v30  ;;  %1579 = vmatpush3.msra.mxu1 %v1111_v48 }
 0xafa   :  { %1571 = vmatprep.subr.mxu0 %v2017_v0  ;;  %1580 = vmatprep.subr.mxu1 %v2017_v0 }
 0xafb   :  { %1572 = vmatpush3.msra.mxu0 %v1024_v31  ;;  %1581 = vmatpush3.msra.mxu1 %v1110_v49 }
 0xafc   :  { %1573 = vmatprep.subr.mxu0 %v2017_v0  ;;  %1582 = vmatprep.subr.mxu1 %v2017_v0 }
 0xafd   :  { %1574 = vmatpush3.msra.mxu0 %v1023_v32  ;;  %1583 = vmatpush3.msra.mxu1 %v1109_v50 }
 0xafe   :  { %1584 = vmatprep.subr.mxu1 %v2017_v0  ;;  %v1449_v0 = vld [vmem:[%s2508_s19] ss:$0 sm:$0xff]  ;;  %s1887_s19 = scalar_lea.vmem %s1370_s30, 32 }
 0xaff   :  { %1585 = vmatpush3.msra.mxu1 %v1108_v51  ;;  %p1888_p8 = scmp.ne.s32.totalorder %s1370_s30, %s1887_s19  ;;  %p1893_p10 = scmp.lt.s32.totalorder %s1887_s19, %s1887_s19 }
 0xb01   :  { %p1894_p11 = por %p1893_p10, %p1892_p9 }
 0xb03   :  { %p1895_p12 = pnand %p1894_p11, %p1888_p8 }
 0xbb6   :  { %v938_v35 = vpop.f32.mrf.mxu0  ;;  %v1019_v36 = vpop.f32.mrf.mxu1 }
 0xbb7   :  { %v939_v37 = vadd.f32 %v1443_v33, %v938_v35  ;;  %v1020_v38 = vadd.f32 %v1445_v34, %v1019_v36 }
 0xbb8   :  { %v1555_v39 = vpop.f32.mrf.mxu0  ;;  %v1566_v40 = vpop.f32.mrf.mxu1 }
 0xbb9   :  { %1345 = vst.msk [vmem:[#allocation20] sm:$0x3] %vm482_vm6, %v939_v37  ;;  %v1199_v41 = vmul.f32 1.442695, %v1020_v38  ;;  %1576 = vmatmul.mubr.msk.f32.vlgmr.msra.gmra.mxu0 %vm208_vm0, %v939_v37  ;;  %1589 = vmatprep.subr.msk.mxu0 %vm1210_vm2, %v939_v37  ;;  %v1201_v42 = vmul.f32 %v939_v37, %v939_v37 }
 0xbba   :  { %1590 = vmatpush3.msk.msra.mxu0 %vm1210_vm2, %v939_v37  ;;  %1591 = vmatprep.mubr.msk.f32.mxu0 %vm1253_vm5, %v1237_v52 }
 0xbbb   :  { %1683 = vpow2.f32 %v1199_v41 }
 0xbbd   :  { %1592 = vmatmul.mubr.msk.f32.vlgmr.msra.gmra.mxu0 %vm1253_vm5, %v1238_v54 }
 0xbc8   :  { %v1684_v43 = vpop.eup %1683 }
 0xbc9   :  { %v1202_v44 = vadd.f32 %v1684_v43, %v1201_v42 }
 0xbcb   :  { %v1451_v45 = vadd.f32 -1.0, %v1202_v44 }
 0xbcd   :  { %v1204_v46 = vsub.f32 %v1451_v45, %v1020_v38 }
 0xbcf   :  { %v1205_v47 = vsel %vm482_vm6, %v1204_v46, 0.0  ;;  %vm1194_vm6 = vcmask 58368  }
 0xbd0   :  { %1206 = vadd.xlane.f32.xlu0 %v1205_v47 }
 0xc79   :  { %v1103_v56 = vpop.f32.mrf.mxu0 }
 0xc7a   :  { %v1104_v57 = vadd.f32 %v1447_v55, %v1103_v56 }
 0xc7b   :  { %v1577_v58 = vpop.f32.mrf.mxu0 }
 0xc7c   :  { %1685 = vtanh.f32 %v1104_v57 }
 0xc7d   :  { %v1593_v4 = vpop.f32.mrf.mxu0 }
 0xc7e   :  { %v1338_v6 = vmul.f32 0.5, %v1593_v4 }
 0xc7f   :  { %v1328_v5 = vpop.f32.mrf.mxu0 }
 0xc80   :  { %v1337_v7 = vmul.f32 0.5, %v1328_v5  ;;  %v1340_v8 = vadd.f32 %v1338_v6, %v2327_v62 }
 0xc82   :  { %v1339_v10 = vadd.f32 %v1337_v7, %v2332_v1 }
 0xc89   :  { %v1686_v59 = vpop.eup %1685 }
 0xc8a   :  { %1587 = vmatmul.mubr.msk.f32.vlgmr.msra.gmra.mxu1 %vm208_vm0, %v1686_v59 }
 0xd4a   :  { %v1188_v60 = vpop.f32.mrf.mxu1 }
 0xd4b   :  { %v1189_v61 = vadd.f32 %v1449_v0, %v1188_v60 }
 0xd4c   :  { %v1588_v53 = vpop.f32.mrf.mxu1 }
 0xd4d   :  { %v1192_v63 = vsub.f32 %v2400_v9, %v1189_v61  ;;  %1346 = vst.msk [vmem:[#allocation22] sm:$0x3] %vm1194_vm6, %v1189_v61 }
 0xd4f   :  { %v1193_v2 = vmul.f32 %v1192_v63, %v1192_v63 }
 0xd51   :  { %v1195_v3 = vsel %vm1194_vm6, %v1193_v2, 0.0 }
 0xd52   :  { %1196 = vadd.xlane.f32.xlu1 %v1195_v3 }
 0xd53   :  { %1898 = shalt.err (!%p1895_p12)
}
 0xd54   :  { %1372 = dma.vmem_to_hbm [thread:$0]  %s1370_s30, 32, %s2511_s22, [#allocation21]   ;;  %1348 = vst.msk [vmem:[#allocation23 + $0x8] sm:$0xff] %vm208_vm0, %v1340_v8  ;;  %1347 = vst.msk [vmem:[#allocation23] sm:$0xff] %vm208_vm0, %v1339_v10 }
 0xd55   :  { %s1907_s20 = scalar_lea.vmem %s1389_s5, 256  ;;  %p1912_p0 = scmp.lt.s32.totalorder %s1389_s5, %s1389_s5 }
 0xd56   :  { %p1908_p13 = scmp.ne.s32.totalorder %s1389_s5, %s1907_s20  ;;  %p1913_p1 = scmp.lt.s32.totalorder %s1907_s20, %s1907_s20 }
 0xd58   :  { %p1914_p2 = por %p1913_p1, %p1912_p0 }
 0xd5a   :  { %p1915_p3 = pnand %p1914_p2, %p1908_p13 }
 0xd5c   :  { %1918 = shalt.err (!%p1915_p3)
}
 0xd5d   :  { %1394 = dma.vmem_to_hbm [thread:$0]  %s1389_s5, 256, %s2513_s24, [#allocation24], %s2007_s27, %s2007_s27, %s2008_s4  }
 0xd5e   :  { %s2034_s29 = smov [#allocation19]   ;;  %s2035_s11 = smov [#allocation22]  }
 0xd5f   :  { %s1359_s22 = sshll.u32 %s2034_s29, 4  ;;  %s1379_s13 = sshll.u32 %s2035_s11, 4  ;;  %s1360_s22 = int_to_ptr.vmem [resolvable:$true] %s1359_s22  ;;  %s1380_s13 = int_to_ptr.vmem [resolvable:$true] %s1379_s13 }
 0xd60   :  { %s1927_s15 = scalar_lea.vmem %s1360_s22, 32  ;;  %p1932_p5 = scmp.lt.s32.totalorder %s1360_s22, %s1360_s22 }
 0xd61   :  { %p1928_p4 = scmp.ne.s32.totalorder %s1360_s22, %s1927_s15  ;;  %p1933_p6 = scmp.lt.s32.totalorder %s1927_s15, %s1927_s15 }
 0xd63   :  { %p1934_p7 = por %p1933_p6, %p1932_p5 }
 0xd65   :  { %p1935_p8 = pnand %p1934_p7, %p1928_p4 }
 0xd67   :  { %1938 = shalt.err (!%p1935_p8)
}
 0xd68   :  { %1362 = dma.vmem_to_hbm [thread:$0]  %s1360_s22, 32, %s2510_s21, [#allocation4]  }
 0xd69   :  { %s1947_s14 = scalar_lea.vmem %s1380_s13, 32  ;;  %p1952_p10 = scmp.lt.s32.totalorder %s1380_s13, %s1380_s13 }
 0xd6a   :  { %p1948_p9 = scmp.ne.s32.totalorder %s1380_s13, %s1947_s14  ;;  %p1953_p11 = scmp.lt.s32.totalorder %s1947_s14, %s1947_s14 }
 0xd6c   :  { %p1954_p12 = por %p1953_p11, %p1952_p10 }
 0xd6e   :  { %p1955_p13 = pnand %p1954_p12, %p1948_p9 }
 0xd70   :  { %1958 = shalt.err (!%p1955_p13)
}
 0xd71   :  { %1382 = dma.vmem_to_hbm [thread:$0]  %s1380_s13, 32, %s2512_s23, [#allocation21]   ;;  %v1207_v62 = vpop.xlane.xlu0 %1206  ;;  %vm1349_vm0 = vcmask 0  }
 0xd72   :  { %v1208_v9 = vmul.f32 0.5, %v1207_v62  ;;  %s2036_s21 = smov [#allocation25]  }
 0xd73   :  { %s1401_s4 = sshll.u32 %s2036_s21, 4  ;;  %s1402_s4 = int_to_ptr.vmem [resolvable:$true] %s1401_s4 }
 0xd74   :  { %s1967_s23 = scalar_lea.vmem %s1402_s4, 16  ;;  %s1971_s16 = scalar_lea.vmem %s1402_s4, 32 }
 0xd75   :  { %p1968_p0 = scmp.ne.s32.totalorder %s1402_s4, %s1967_s23  ;;  %p1972_p1 = scmp.lt.s32.totalorder %s1402_s4, %s1402_s4 }
 0xd76   :  { %p1973_p2 = scmp.lt.s32.totalorder %s1971_s16, %s1967_s23 }
 0xd78   :  { %p1974_p3 = por %p1973_p2, %p1972_p1 }
 0xd7a   :  { %p1975_p4 = pnand %p1974_p3, %p1968_p0 }
 0xddb   :  { %v1197_v1 = vpop.xlane.xlu1 %1196 }
 0xddc   :  { %v1198_v11 = vmul.f32 -0.5, %v1197_v1 }
 0xdde   :  { %v1209_v12 = vsub.f32 %v1198_v11, %v1208_v9 }
 0xde0   :  { %v1211_v13 = vsel %vm1210_vm2, %v1209_v12, 0.0 }
 0xde1   :  { %v1212_v14 = vrot.slane %v1211_v13, 4 }
 0xde3   :  { %v1213_v16 = vadd.f32 %v1212_v14, %v1211_v13 }
 0xde5   :  { %v1214_v17 = vrot.slane %v1213_v16, 2 }
 0xde7   :  { %v1215_v18 = vadd.f32 %v1214_v17, %v1213_v16 }
 0xde9   :  { %v1216_v19 = vrot.slane %v1215_v18, 1 }
 0xdeb   :  { %v1217_v15 = vadd.f32 %v1216_v19, %v1215_v18 }
 0xded   :  { %v1219_v20 = vmul.f32 0.5, %v1217_v15 }
 0xdef   :  { %1350 = vst.msk [vmem:[#allocation25] sm:$0x1] %vm1349_vm0, %v1219_v20 }
 0xdf0   :  { %1978 = shalt.err (!%p1975_p4)
}
 0xdf1   :  { %1404 = dma.vmem_to_hbm [thread:$0]  %s1402_s4, 16, %s2514_s25, [#allocation24]  }
 0xdf2   :  { %1999 = dma.done.wait [#allocation4], 32  }
 0xdf3   :  { %2000 = vsyncadd [#allocation4], 4294967264 }
 0xdf4   :  { %2001 = dma.done.wait [#allocation21], 64  }
 0xdf5   :  { %2002 = vsyncadd [#allocation21], 4294967232 }
 0xdf6   :  { %2003 = dma.done.wait [#allocation24], 272  }
 0xdf7   :  { %2004 = vsyncadd [#allocation24], 4294967024 }
 0xdf8   :  { %1422 = vsyncpa [#allocation3], 1 }
 0xdf9   :  { %1423 = vsyncpa [#allocation6], 1 }
 0xdfa   :  { %1424 = vsyncpa [#allocation9], 1 }
 0xdfb   :  { %1425 = vsyncpa [#allocation12], 1 }
 0xdfc   :  { %1426 = vsyncpa [#allocation15], 1 }
 0xdfd   :  { %1427 = vsyncpa [#allocation18], 1 }
 0xdfe   :  { %1428 = vsyncpa [#allocation4], 1 }
 0xdff   :  { %1429 = vsyncpa [#allocation21], 1 }
 0xe00   :  { %1430 = vsyncpa [#allocation24], 1 }

</bundles_post_ra>
